<compile_context>
chip_gen: v5e
topology: v5e:2x2
jax: 0.10.0
libtpu: 0.0.40
codegen_flags: <defaults>
</compile_context>

<pallas_src>
import jax
import jax.numpy as jnp
from jax.experimental import pallas as pl
from jax.experimental.pallas import tpu as pltpu

# ----------------------------- config (small, synthetic) -----------------------------
B = 2            # batch size
S = 8            # sequence length
H = 32           # hidden size == args.projection_size
NH = 4           # attention heads
DH = H // NH     # head dim
FF = 64          # intermediate size
VOCAB = 100
MAXPOS = 40
NLAYERS = 2
QUEUE = 64       # args.queue_size (divisible by batch)
TEMP = 0.05      # args.temp
MOMENTUM = 0.999
LABEL_SMOOTH = 0.05   # hard-coded in Moco.forward's cross_entropy call
LN_EPS = 1e-5
NEG_INF = -1e9

# ---------------------------- packed-slab layout constants ----------------------------
WCOLS = 3 * H                     # 96: widest matmul weight (wqkv) -> slab column width
WL_ROWS = 3 * H + FF              # per-layer rows: wqkv(H) + wo(H) + w1(H) + w2(FF) = 160
MLP_W_ROW = NLAYERS * WL_ROWS     # 320
WROWS = MLP_W_ROW + H             # 352
VL_ROWS = 8                       # per-layer bias/LN vector rows
MLP_B_ROW = 2 + NLAYERS * VL_ROWS # 18
VROWS = MLP_B_ROW + 1             # 19


# --------------------------------- in-kernel helpers ----------------------------------
def _ln(x, g, b):
    mu = jnp.mean(x, axis=-1, keepdims=True)
    var = jnp.mean((x - mu) ** 2, axis=-1, keepdims=True)
    return (x - mu) * jax.lax.rsqrt(var + LN_EPS) * g + b


def _mm(a, w_bf16):
    # activations cast to bf16 at the matmul; weights are pre-cast bf16; f32 accumulation.
    return jnp.dot(a.astype(jnp.bfloat16), w_bf16, preferred_element_type=jnp.float32)


# --------------------- fused Siamese encoder + MoCo-loss kernel -----------------------
def _moco_kernel(x_ref, bias_ref, w_ref, v_ref, queue_ref,
                 pooled_ref, loss_ref, q_scratch):
    e = pl.program_id(0)                      # 0 = query encoder, 1 = key encoder
    x = x_ref[0]                              # (B*S, H) f32, already embedded
    vs = v_ref[0]                             # (VROWS, WCOLS) f32 bias/LN slab
    bias3 = bias_ref[0][:, None, :]           # (B, 1, S) additive attention mask
    # TODO(synk): dropout inside RoBERTa is stochastic and skipped (deterministic kernel).

    def vrow(idx, width):
        return vs[idx:idx + 1, 0:width]       # (1, width) static slice

    x = _ln(x, vrow(0, H), vrow(1, H))        # embeddings LayerNorm
    scale = 1.0 / (DH ** 0.5)

    for l in range(NLAYERS):
        wbase = l * WL_ROWS
        vbase = 2 + l * VL_ROWS

        # fused Q|K|V projection: one (B*S,H) x (H,3H) matmul
        wqkv = w_ref[0, wbase:wbase + H, :]                      # (H, 3H) bf16
        qkv = _mm(x, wqkv) + vrow(vbase + 0, 3 * H)              # (B*S, 3H) f32

        # attention batched over B via 3-D einsums; static unroll over NH=4 heads
        head_outs = []
        for h in range(NH):
            c0 = h * DH
            qh = qkv[:, c0:c0 + DH].reshape(B, S, DH)
            kh = qkv[:, H + c0:H + c0 + DH].reshape(B, S, DH)
            vh = qkv[:, 2 * H + c0:2 * H + c0 + DH].reshape(B, S, DH)
            s = jnp.einsum('bqd,bkd->bqk', qh, kh,
                           preferred_element_type=jnp.float32) * scale + bias3
            s = s - jnp.max(s, axis=-1, keepdims=True)
            p = jnp.exp(s)
            p = p * pl.reciprocal(jnp.sum(p, axis=-1, keepdims=True), approx=True)
            ctx_h = jnp.einsum('bqk,bkd->bqd', p, vh,
                               preferred_element_type=jnp.float32)
            head_outs.append(ctx_h.reshape(B * S, DH))
        ctx = jnp.concatenate(head_outs, axis=-1)                # (B*S, H)

        # attention output projection + residual + LN
        wo = w_ref[0, wbase + H:wbase + 2 * H, :][:, 0:H]
        attn_out = _mm(ctx, wo) + vrow(vbase + 1, H)
        x = _ln(x + attn_out, vrow(vbase + 2, H), vrow(vbase + 3, H))

        # FFN + residual + LN
        w1 = w_ref[0, wbase + 2 * H:wbase + 3 * H, :][:, 0:FF]
        ff = _mm(x, w1) + vrow(vbase + 4, FF)
        # TODO(synk): HF RoBERTa uses exact erf-GELU; tanh approximation for robust lowering.
        ff = jax.nn.gelu(ff, approximate=True)
        w2 = w_ref[0, wbase + 3 * H:wbase + 3 * H + FF, :][:, 0:H]
        ff = _mm(ff, w2) + vrow(vbase + 5, H)
        x = _ln(x + ff, vrow(vbase + 6, H), vrow(vbase + 7, H))

    # CLS pooling then MLP head — MLP is pointwise, so applying it to the B CLS rows only
    # equals MLP-on-all-tokens followed by the "cls" Pooler (pooler_type assumed "cls").
    x_cls = x.reshape(B, S, H)[:, 0, :]                          # (B, H)
    mlp_w = w_ref[0, MLP_W_ROW:MLP_W_ROW + H, :][:, 0:H]
    pooled = jnp.tanh(_mm(x_cls, mlp_w) + vrow(MLP_B_ROW, H))    # (B, H)
    pooled_ref[0] = pooled

    @pl.when(e == 0)
    def _():
        q_scratch[...] = pooled                # carry pooled_q to the key-encoder step
        loss_ref[...] = jnp.zeros_like(loss_ref)

    @pl.when(e == 1)
    def _():
        q = q_scratch[...]                     # pooled_q (B, H)
        k = pooled                             # pooled_k (B, H)
        qu = queue_ref[...]                    # (H, QUEUE) negatives
        eps = 1e-8                             # torch cosine_similarity eps (clamp each norm)
        qn = jnp.maximum(jnp.sqrt(jnp.sum(q * q, axis=-1, keepdims=True)), eps)
        kn = jnp.maximum(jnp.sqrt(jnp.sum(k * k, axis=-1, keepdims=True)), eps)
        l_pos = jnp.sum(q * k, axis=-1, keepdims=True) / (qn * kn)              # (B, 1)
        col_n = jnp.maximum(jnp.sqrt(jnp.sum(qu * qu, axis=0, keepdims=True)), eps)
        l_neg = jnp.dot(q, qu, preferred_element_type=jnp.float32) / (qn * col_n)  # (B, Q)
        zp = l_pos / TEMP
        zn = l_neg / TEMP
        # cross-entropy with labels == 0 (positive is class 0), label smoothing, mean reduce
        m = jnp.maximum(jnp.max(zn, axis=-1, keepdims=True), zp)
        lse = jnp.log(jnp.exp(zp - m)
                      + jnp.sum(jnp.exp(zn - m), axis=-1, keepdims=True)) + m
        num_classes = QUEUE + 1
        nll = -(zp - lse)
        sum_logp = (zp - lse) + jnp.sum(zn - lse, axis=-1, keepdims=True)
        smooth = -sum_logp / num_classes
        loss = (1.0 - LABEL_SMOOTH) * nll + LABEL_SMOOTH * smooth               # (B, 1)
        loss_ref[...] = jnp.broadcast_to(jnp.sum(loss) / B, (1, 1))


def fused_moco_call(x_emb2, bias2, wslab2, vslab2, queue):
    return pl.pallas_call(
        _moco_kernel,
        out_shape=(jax.ShapeDtypeStruct((2, B, H), jnp.float32),
                   jax.ShapeDtypeStruct((1, 1), jnp.float32)),
        grid=(2,),
        in_specs=[
            pl.BlockSpec((1, B * S, H), lambda e: (e, 0, 0)),        # embedded tokens
            pl.BlockSpec((1, B, S), lambda e: (e, 0, 0)),            # attention-mask bias
            pl.BlockSpec((1, WROWS, WCOLS), lambda e: (e, 0, 0)),    # bf16 weight slab
            pl.BlockSpec((1, VROWS, WCOLS), lambda e: (e, 0, 0)),    # f32 bias/LN slab
            pl.BlockSpec((H, QUEUE), lambda e: (0, 0)),              # MoCo queue (resident)
        ],
        out_specs=(pl.BlockSpec((1, B, H), lambda e: (e, 0, 0)),     # pooled_q / pooled_k
                   pl.BlockSpec((1, 1), lambda e: (0, 0))),          # fused loss
        scratch_shapes=[pltpu.VMEM((B, H), jnp.float32)],            # pooled_q carry
        compiler_params=pltpu.CompilerParams(
            # step 1 (key encoder + loss) consumes scratch written at step 0
            dimension_semantics=("arbitrary",)),
    )(x_emb2, bias2, wslab2, vslab2, queue)


# --------------------------- parameter packing (init-time only) ------------------------
def _pad_cols(m, cols=WCOLS):
    pad = cols - m.shape[-1]
    return jnp.pad(m, ((0, 0), (0, pad))) if pad else m


def pack_weight_slab(raw):
    rows = []
    for l in raw["layers"]:
        rows.append(jnp.concatenate([l["wq"], l["wk"], l["wv"]], axis=1))   # (H, 3H)
        rows.append(_pad_cols(l["wo"]))
        rows.append(_pad_cols(l["w1"]))
        rows.append(_pad_cols(l["w2"]))
    rows.append(_pad_cols(raw["mlp_w"]))
    return jnp.concatenate(rows, axis=0)            # (WROWS, WCOLS)


def pack_vector_slab(raw):
    def row(v):
        return _pad_cols(v.reshape(1, -1))
    rows = [row(raw["emb_ln_g"]), row(raw["emb_ln_b"])]
    for l in raw["layers"]:
        rows.append(row(jnp.concatenate([l["bq"], l["bk"], l["bv"]])))
        rows.append(row(l["bo"]))
        rows.append(row(l["ln1_g"]))
        rows.append(row(l["ln1_b"]))
        rows.append(row(l["b1"]))
        rows.append(row(l["b2"]))
        rows.append(row(l["ln2_g"]))
        rows.append(row(l["ln2_b"]))
    rows.append(row(raw["mlp_b"]))
    return jnp.concatenate(rows, axis=0)            # (VROWS, WCOLS)


# ------------------------------- JAX glue (embeddings) --------------------------------
def embed(params, input_ids, attention_mask):
    mask_i = attention_mask.astype(jnp.int32)
    # RoBERTa position ids (padding_idx = 1)
    position_ids = jnp.cumsum(mask_i, axis=1) * mask_i + 1
    x = (params["word_emb"][input_ids]
         + params["pos_emb"][position_ids]
         + params["type_emb"][0])
    return x.reshape(-1, H)


# ----------------------------------- Moco forward --------------------------------------
def moco_forward(params_q, params_k, queue, input_ids, attention_mask, teacher_pred=None):
    # teacher_pred is accepted (as in the PyTorch signature) but unused by the loss path.
    del teacher_pred
    Bq = input_ids.shape[0]
    q_tokens, k_tokens = input_ids[:, 0, :], input_ids[:, 1, :]
    q_mask = attention_mask[:, 0, :].astype(jnp.float32)
    k_mask = attention_mask[:, 1, :].astype(jnp.float32)

    # momentum update of the key encoder (no_grad in torch) — params live permanently
    # in the packed layout, so this is 5 elementwise ops rather than ~40.
    params_k = jax.tree_util.tree_map(
        lambda pk, pq: pk * MOMENTUM + pq * (1.0 - MOMENTUM), params_k, params_q)

    # embedding gathers stay in JAX; everything else runs in one fused pallas_call.
    x_emb2 = jnp.stack([embed(params_q, q_tokens, q_mask),
                        embed(params_k, k_tokens, k_mask)], axis=0)           # (2, B*S, H)
    bias2 = jnp.stack([(1.0 - q_mask) * NEG_INF,
                       (1.0 - k_mask) * NEG_INF], axis=0)                     # (2, B, S)
    wslab2 = jnp.stack([params_q["wslab"], params_k["wslab"]],
                       axis=0).astype(jnp.bfloat16)                           # bf16 weights
    vslab2 = jnp.stack([params_q["vslab"], params_k["vslab"]], axis=0)        # f32 vectors

    pooled, loss = fused_moco_call(x_emb2, bias2, wslab2, vslab2, queue)
    pooled_k = pooled[1]

    # dequeue and enqueue
    new_queue = jnp.concatenate([queue[:, Bq:], pooled_k.T], axis=1)
    return loss[0, 0], new_queue, params_k


# ------------------------------------ param init ---------------------------------------
def init_params(key):
    keys = jax.random.split(key, 64)
    it = iter(keys)

    def dense(din, dout):
        return jax.random.normal(next(it), (din, dout), jnp.float32) * 0.02

    raw = {
        "word_emb": jax.random.normal(next(it), (VOCAB, H), jnp.float32) * 0.02,
        "pos_emb": jax.random.normal(next(it), (MAXPOS, H), jnp.float32) * 0.02,
        "type_emb": jax.random.normal(next(it), (1, H), jnp.float32) * 0.02,
        "emb_ln_g": jnp.ones((H,), jnp.float32),
        "emb_ln_b": jnp.zeros((H,), jnp.float32),
        "mlp_w": dense(H, H),
        "mlp_b": jnp.zeros((H,), jnp.float32),
        "layers": [],
    }
    for _ in range(NLAYERS):
        raw["layers"].append({
            "wq": dense(H, H), "bq": jnp.zeros((H,), jnp.float32),
            "wk": dense(H, H), "bk": jnp.zeros((H,), jnp.float32),
            "wv": dense(H, H), "bv": jnp.zeros((H,), jnp.float32),
            "wo": dense(H, H), "bo": jnp.zeros((H,), jnp.float32),
            "ln1_g": jnp.ones((H,), jnp.float32), "ln1_b": jnp.zeros((H,), jnp.float32),
            "w1": dense(H, FF), "b1": jnp.zeros((FF,), jnp.float32),
            "w2": dense(FF, H), "b2": jnp.zeros((H,), jnp.float32),
            "ln2_g": jnp.ones((H,), jnp.float32), "ln2_b": jnp.zeros((H,), jnp.float32),
        })
    # parameters are stored permanently in packed-slab layout (packing happens once here).
    return {
        "word_emb": raw["word_emb"],
        "pos_emb": raw["pos_emb"],
        "type_emb": raw["type_emb"],
        "wslab": pack_weight_slab(raw),    # (WROWS, 3H) f32 master copy (bf16 at call site)
        "vslab": pack_vector_slab(raw),    # (VROWS, 3H) f32
    }


# --------------------------------------- main ------------------------------------------
if __name__ == "__main__":
    key = jax.random.PRNGKey(0)
    k_params, k_queue, k_ids, _ = jax.random.split(key, 4)

    params_q = init_params(k_params)
    # encoder_k = deepcopy(encoder_q)
    params_k = jax.tree_util.tree_map(lambda x: x, params_q)

    queue = jax.random.normal(k_queue, (H, QUEUE), jnp.float32)
    queue = queue / jnp.linalg.norm(queue, axis=0, keepdims=True)    # normalize(dim=0)

    input_ids = jax.random.randint(k_ids, (B, 2, S), 2, VOCAB, dtype=jnp.int32)
    attention_mask = jnp.ones((B, 2, S), jnp.float32)
    attention_mask = attention_mask.at[0, 0, S - 2:].set(0.0)        # exercise masking
    teacher_pred = jnp.zeros((B, B), jnp.float32)                    # unused by forward

    loss, new_queue, params_k = jax.jit(moco_forward)(
        params_q, params_k, queue, input_ids, attention_mask, teacher_pred)
    jax.block_until_ready(loss)
    jax.block_until_ready(new_queue)
    assert loss.shape == () and bool(jnp.isfinite(loss))
    assert new_queue.shape == (H, QUEUE)
    print("KERNEL_OK")
</pallas_src>

<mosaic_0001>
module attributes {stable_mosaic.version = 11 : i64} {
  func.func @_moco_kernel(%arg0: i32, %arg1: memref<1x16x32xf32, #tpu.memory_space<vmem>>, %arg2: memref<1x2x8xf32, #tpu.memory_space<vmem>>, %arg3: memref<1x352x96xbf16, #tpu.memory_space<vmem>>, %arg4: memref<1x19x96xf32, #tpu.memory_space<vmem>>, %arg5: memref<32x64xf32, #tpu.memory_space<vmem>>, %arg6: memref<1x2x32xf32, #tpu.memory_space<vmem>>, %arg7: memref<1x1xf32, #tpu.memory_space<vmem>>, %arg8: memref<2x32xf32, #tpu.memory_space<vmem>>) attributes {dimension_semantics = [#tpu.dimension_semantics<arbitrary>], iteration_bounds = array<i64: 2>, scalar_prefetch = 0 : i64, scratch_operands = 1 : i64, tpu.core_type = #tpu.core_type<tc>, window_params = [{transform_indices = @transform_0, window_bounds = array<i64: 1, 16, 32>}, {transform_indices = @transform_1, window_bounds = array<i64: 1, 2, 8>}, {transform_indices = @transform_2, window_bounds = array<i64: 1, 352, 96>}, {transform_indices = @transform_3, window_bounds = array<i64: 1, 19, 96>}, {pipeline_mode = #tpu.pipeline_mode<synchronous>, transform_indices = @transform_4, window_bounds = array<i64: 32, 64>}, {transform_indices = @transform_5, window_bounds = array<i64: 1, 2, 32>}, {pipeline_mode = #tpu.pipeline_mode<synchronous>, transform_indices = @transform_6, window_bounds = array<i64: 1, 1>}]} {
    %c0 = arith.constant 0 : index
    %c0_0 = arith.constant 0 : index
    %c0_1 = arith.constant 0 : index
    %0 = vector.load %arg1[%c0, %c0_0, %c0_1] : memref<1x16x32xf32, #tpu.memory_space<vmem>>, vector<1x16x32xf32>
    %1 = vector.shape_cast %0 : vector<1x16x32xf32> to vector<16x32xf32>
    %c0_2 = arith.constant 0 : index
    %c0_3 = arith.constant 0 : index
    %c0_4 = arith.constant 0 : index
    %2 = vector.load %arg4[%c0_2, %c0_3, %c0_4] : memref<1x19x96xf32, #tpu.memory_space<vmem>>, vector<1x19x96xf32>
    %3 = vector.shape_cast %2 : vector<1x19x96xf32> to vector<19x96xf32>
    %c0_5 = arith.constant 0 : index
    %c0_6 = arith.constant 0 : index
    %c0_7 = arith.constant 0 : index
    %4 = vector.load %arg2[%c0_5, %c0_6, %c0_7] : memref<1x2x8xf32, #tpu.memory_space<vmem>>, vector<1x2x8xf32>
    %5 = vector.shape_cast %4 : vector<1x2x8xf32> to vector<2x8xf32>
    %6 = vector.shape_cast %5 : vector<2x8xf32> to vector<2x1x8xf32>
    %7 = vector.extract_strided_slice %3 {offsets = [0, 0], sizes = [1, 32], strides = [1, 1]} : vector<19x96xf32> to vector<1x32xf32>
    %8 = vector.extract_strided_slice %3 {offsets = [1, 0], sizes = [1, 32], strides = [1, 1]} : vector<19x96xf32> to vector<1x32xf32>
    %cst = arith.constant dense<0.000000e+00> : vector<16xf32>
    %9 = vector.multi_reduction <add>, %1, %cst [1] : vector<16x32xf32> to vector<16xf32>
    %10 = vector.shape_cast %9 : vector<16xf32> to vector<16x1xf32>
    %cst_8 = arith.constant 3.200000e+01 : f32
    %11 = vector.broadcast %cst_8 : f32 to vector<16x1xf32>
    %12 = arith.divf %10, %11 : vector<16x1xf32>
    %13 = vector.broadcast %12 : vector<16x1xf32> to vector<16x32xf32>
    %14 = arith.subf %1, %13 : vector<16x32xf32>
    %15 = arith.mulf %14, %14 : vector<16x32xf32>
    %cst_9 = arith.constant dense<0.000000e+00> : vector<16xf32>
    %16 = vector.multi_reduction <add>, %15, %cst_9 [1] : vector<16x32xf32> to vector<16xf32>
    %17 = vector.shape_cast %16 : vector<16xf32> to vector<16x1xf32>
    %cst_10 = arith.constant 3.200000e+01 : f32
    %18 = vector.broadcast %cst_10 : f32 to vector<16x1xf32>
    %19 = arith.divf %17, %18 : vector<16x1xf32>
    %20 = vector.broadcast %12 : vector<16x1xf32> to vector<16x32xf32>
    %21 = arith.subf %1, %20 : vector<16x32xf32>
    %cst_11 = arith.constant 9.99999974E-6 : f32
    %22 = vector.broadcast %cst_11 : f32 to vector<16x1xf32>
    %23 = arith.addf %19, %22 : vector<16x1xf32>
    %24 = math.rsqrt %23 : vector<16x1xf32>
    %25 = vector.broadcast %24 : vector<16x1xf32> to vector<16x32xf32>
    %26 = arith.mulf %21, %25 : vector<16x32xf32>
    %27 = vector.broadcast %7 : vector<1x32xf32> to vector<16x32xf32>
    %28 = arith.mulf %26, %27 : vector<16x32xf32>
    %29 = vector.broadcast %8 : vector<1x32xf32> to vector<16x32xf32>
    %30 = arith.addf %28, %29 : vector<16x32xf32>
    %c0_12 = arith.constant 0 : index
    %c0_13 = arith.constant 0 : index
    %c0_14 = arith.constant 0 : index
    %31 = vector.load %arg3[%c0_12, %c0_13, %c0_14] : memref<1x352x96xbf16, #tpu.memory_space<vmem>>, vector<1x32x96xbf16>
    %32 = vector.shape_cast %31 : vector<1x32x96xbf16> to vector<32x96xbf16>
    %33 = arith.truncf %30 : vector<16x32xf32> to vector<16x32xbf16>
    %cst_15 = arith.constant dense<0.000000e+00> : vector<16x96xf32>
    %34 = tpu.matmul %33, %32, %cst_15 {dimension_numbers = #tpu.dot_dimension_numbers<[1], [0], [0], [1], [0, 0, 1, 1], [], []>} : vector<16x32xbf16>, vector<32x96xbf16>, vector<16x96xf32> -> vector<16x96xf32>
    %35 = vector.extract_strided_slice %3 {offsets = [2, 0], sizes = [1, 96], strides = [1, 1]} : vector<19x96xf32> to vector<1x96xf32>
    %36 = vector.broadcast %35 : vector<1x96xf32> to vector<16x96xf32>
    %37 = arith.addf %34, %36 : vector<16x96xf32>
    %38 = vector.extract_strided_slice %37 {offsets = [0, 0], sizes = [16, 8], strides = [1, 1]} : vector<16x96xf32> to vector<16x8xf32>
    %39 = vector.shape_cast %38 : vector<16x8xf32> to vector<2x8x8xf32>
    %40 = vector.extract_strided_slice %37 {offsets = [0, 32], sizes = [16, 8], strides = [1, 1]} : vector<16x96xf32> to vector<16x8xf32>
    %41 = vector.shape_cast %40 : vector<16x8xf32> to vector<2x8x8xf32>
    %42 = vector.extract_strided_slice %37 {offsets = [0, 64], sizes = [16, 8], strides = [1, 1]} : vector<16x96xf32> to vector<16x8xf32>
    %43 = vector.shape_cast %42 : vector<16x8xf32> to vector<2x8x8xf32>
    "tpu.trace_start"() <{level = 10 : i32, message = "bqd,bkd->bqk"}> : () -> ()
    %cst_16 = arith.constant dense<0.000000e+00> : vector<2x8x8xf32>
    %44 = tpu.matmul %39, %41, %cst_16 {dimension_numbers = #tpu.dot_dimension_numbers<[2], [2], [1], [1], [0, 0, 0, 1, 1, 1], [0], [0]>} : vector<2x8x8xf32>, vector<2x8x8xf32>, vector<2x8x8xf32> -> vector<2x8x8xf32>
    "tpu.trace_stop"() : () -> ()
    %cst_17 = arith.constant 0.353553385 : f32
    %45 = vector.broadcast %cst_17 : f32 to vector<2x8x8xf32>
    %46 = arith.mulf %44, %45 : vector<2x8x8xf32>
    %47 = vector.broadcast %6 : vector<2x1x8xf32> to vector<2x8x8xf32>
    %48 = arith.addf %46, %47 : vector<2x8x8xf32>
    %cst_18 = arith.constant dense<0xFF800000> : vector<2x8xf32>
    %49 = vector.multi_reduction <maximumf>, %48, %cst_18 [2] : vector<2x8x8xf32> to vector<2x8xf32>
    %50 = vector.shape_cast %49 : vector<2x8xf32> to vector<2x8x1xf32>
    %51 = vector.broadcast %50 : vector<2x8x1xf32> to vector<2x8x8xf32>
    %52 = arith.subf %48, %51 : vector<2x8x8xf32>
    %53 = math.exp %52 : vector<2x8x8xf32>
    %cst_19 = arith.constant dense<0.000000e+00> : vector<2x8xf32>
    %54 = vector.multi_reduction <add>, %53, %cst_19 [2] : vector<2x8x8xf32> to vector<2x8xf32>
    %55 = vector.shape_cast %54 : vector<2x8xf32> to vector<2x8x1xf32>
    %56 = tpu.reciprocal %55 {approx = true} : vector<2x8x1xf32> -> vector<2x8x1xf32>
    %57 = vector.broadcast %56 : vector<2x8x1xf32> to vector<2x8x8xf32>
    %58 = arith.mulf %53, %57 : vector<2x8x8xf32>
    "tpu.trace_start"() <{level = 10 : i32, message = "bqk,bkd->bqd"}> : () -> ()
    %cst_20 = arith.constant dense<0.000000e+00> : vector<2x8x8xf32>
    %59 = tpu.matmul %58, %43, %cst_20 {dimension_numbers = #tpu.dot_dimension_numbers<[2], [1], [1], [2], [0, 0, 0, 1, 1, 2], [0], [0]>} : vector<2x8x8xf32>, vector<2x8x8xf32>, vector<2x8x8xf32> -> vector<2x8x8xf32>
    "tpu.trace_stop"() : () -> ()
    %60 = vector.shape_cast %59 : vector<2x8x8xf32> to vector<16x8xf32>
    %61 = vector.extract_strided_slice %37 {offsets = [0, 8], sizes = [16, 8], strides = [1, 1]} : vector<16x96xf32> to vector<16x8xf32>
    %62 = vector.shape_cast %61 : vector<16x8xf32> to vector<2x8x8xf32>
    %63 = vector.extract_strided_slice %37 {offsets = [0, 40], sizes = [16, 8], strides = [1, 1]} : vector<16x96xf32> to vector<16x8xf32>
    %64 = vector.shape_cast %63 : vector<16x8xf32> to vector<2x8x8xf32>
    %65 = vector.extract_strided_slice %37 {offsets = [0, 72], sizes = [16, 8], strides = [1, 1]} : vector<16x96xf32> to vector<16x8xf32>
    %66 = vector.shape_cast %65 : vector<16x8xf32> to vector<2x8x8xf32>
    "tpu.trace_start"() <{level = 10 : i32, message = "bqd,bkd->bqk"}> : () -> ()
    %cst_21 = arith.constant dense<0.000000e+00> : vector<2x8x8xf32>
    %67 = tpu.matmul %62, %64, %cst_21 {dimension_numbers = #tpu.dot_dimension_numbers<[2], [2], [1], [1], [0, 0, 0, 1, 1, 1], [0], [0]>} : vector<2x8x8xf32>, vector<2x8x8xf32>, vector<2x8x8xf32> -> vector<2x8x8xf32>
    "tpu.trace_stop"() : () -> ()
    %cst_22 = arith.constant 0.353553385 : f32
    %68 = vector.broadcast %cst_22 : f32 to vector<2x8x8xf32>
    %69 = arith.mulf %67, %68 : vector<2x8x8xf32>
    %70 = vector.broadcast %6 : vector<2x1x8xf32> to vector<2x8x8xf32>
    %71 = arith.addf %69, %70 : vector<2x8x8xf32>
    %cst_23 = arith.constant dense<0xFF800000> : vector<2x8xf32>
    %72 = vector.multi_reduction <maximumf>, %71, %cst_23 [2] : vector<2x8x8xf32> to vector<2x8xf32>
    %73 = vector.shape_cast %72 : vector<2x8xf32> to vector<2x8x1xf32>
    %74 = vector.broadcast %73 : vector<2x8x1xf32> to vector<2x8x8xf32>
    %75 = arith.subf %71, %74 : vector<2x8x8xf32>
    %76 = math.exp %75 : vector<2x8x8xf32>
    %cst_24 = arith.constant dense<0.000000e+00> : vector<2x8xf32>
    %77 = vector.multi_reduction <add>, %76, %cst_24 [2] : vector<2x8x8xf32> to vector<2x8xf32>
    %78 = vector.shape_cast %77 : vector<2x8xf32> to vector<2x8x1xf32>
    %79 = tpu.reciprocal %78 {approx = true} : vector<2x8x1xf32> -> vector<2x8x1xf32>
    %80 = vector.broadcast %79 : vector<2x8x1xf32> to vector<2x8x8xf32>
    %81 = arith.mulf %76, %80 : vector<2x8x8xf32>
    "tpu.trace_start"() <{level = 10 : i32, message = "bqk,bkd->bqd"}> : () -> ()
    %cst_25 = arith.constant dense<0.000000e+00> : vector<2x8x8xf32>
    %82 = tpu.matmul %81, %66, %cst_25 {dimension_numbers = #tpu.dot_dimension_numbers<[2], [1], [1], [2], [0, 0, 0, 1, 1, 2], [0], [0]>} : vector<2x8x8xf32>, vector<2x8x8xf32>, vector<2x8x8xf32> -> vector<2x8x8xf32>
    "tpu.trace_stop"() : () -> ()
    %83 = vector.shape_cast %82 : vector<2x8x8xf32> to vector<16x8xf32>
    %84 = vector.extract_strided_slice %37 {offsets = [0, 16], sizes = [16, 8], strides = [1, 1]} : vector<16x96xf32> to vector<16x8xf32>
    %85 = vector.shape_cast %84 : vector<16x8xf32> to vector<2x8x8xf32>
    %86 = vector.extract_strided_slice %37 {offsets = [0, 48], sizes = [16, 8], strides = [1, 1]} : vector<16x96xf32> to vector<16x8xf32>
    %87 = vector.shape_cast %86 : vector<16x8xf32> to vector<2x8x8xf32>
    %88 = vector.extract_strided_slice %37 {offsets = [0, 80], sizes = [16, 8], strides = [1, 1]} : vector<16x96xf32> to vector<16x8xf32>
    %89 = vector.shape_cast %88 : vector<16x8xf32> to vector<2x8x8xf32>
    "tpu.trace_start"() <{level = 10 : i32, message = "bqd,bkd->bqk"}> : () -> ()
    %cst_26 = arith.constant dense<0.000000e+00> : vector<2x8x8xf32>
    %90 = tpu.matmul %85, %87, %cst_26 {dimension_numbers = #tpu.dot_dimension_numbers<[2], [2], [1], [1], [0, 0, 0, 1, 1, 1], [0], [0]>} : vector<2x8x8xf32>, vector<2x8x8xf32>, vector<2x8x8xf32> -> vector<2x8x8xf32>
    "tpu.trace_stop"() : () -> ()
    %cst_27 = arith.constant 0.353553385 : f32
    %91 = vector.broadcast %cst_27 : f32 to vector<2x8x8xf32>
    %92 = arith.mulf %90, %91 : vector<2x8x8xf32>
    %93 = vector.broadcast %6 : vector<2x1x8xf32> to vector<2x8x8xf32>
    %94 = arith.addf %92, %93 : vector<2x8x8xf32>
    %cst_28 = arith.constant dense<0xFF800000> : vector<2x8xf32>
    %95 = vector.multi_reduction <maximumf>, %94, %cst_28 [2] : vector<2x8x8xf32> to vector<2x8xf32>
    %96 = vector.shape_cast %95 : vector<2x8xf32> to vector<2x8x1xf32>
    %97 = vector.broadcast %96 : vector<2x8x1xf32> to vector<2x8x8xf32>
    %98 = arith.subf %94, %97 : vector<2x8x8xf32>
    %99 = math.exp %98 : vector<2x8x8xf32>
    %cst_29 = arith.constant dense<0.000000e+00> : vector<2x8xf32>
    %100 = vector.multi_reduction <add>, %99, %cst_29 [2] : vector<2x8x8xf32> to vector<2x8xf32>
    %101 = vector.shape_cast %100 : vector<2x8xf32> to vector<2x8x1xf32>
    %102 = tpu.reciprocal %101 {approx = true} : vector<2x8x1xf32> -> vector<2x8x1xf32>
    %103 = vector.broadcast %102 : vector<2x8x1xf32> to vector<2x8x8xf32>
    %104 = arith.mulf %99, %103 : vector<2x8x8xf32>
    "tpu.trace_start"() <{level = 10 : i32, message = "bqk,bkd->bqd"}> : () -> ()
    %cst_30 = arith.constant dense<0.000000e+00> : vector<2x8x8xf32>
    %105 = tpu.matmul %104, %89, %cst_30 {dimension_numbers = #tpu.dot_dimension_numbers<[2], [1], [1], [2], [0, 0, 0, 1, 1, 2], [0], [0]>} : vector<2x8x8xf32>, vector<2x8x8xf32>, vector<2x8x8xf32> -> vector<2x8x8xf32>
    "tpu.trace_stop"() : () -> ()
    %106 = vector.shape_cast %105 : vector<2x8x8xf32> to vector<16x8xf32>
    %107 = vector.extract_strided_slice %37 {offsets = [0, 24], sizes = [16, 8], strides = [1, 1]} : vector<16x96xf32> to vector<16x8xf32>
    %108 = vector.shape_cast %107 : vector<16x8xf32> to vector<2x8x8xf32>
    %109 = vector.extract_strided_slice %37 {offsets = [0, 56], sizes = [16, 8], strides = [1, 1]} : vector<16x96xf32> to vector<16x8xf32>
    %110 = vector.shape_cast %109 : vector<16x8xf32> to vector<2x8x8xf32>
    %111 = vector.extract_strided_slice %37 {offsets = [0, 88], sizes = [16, 8], strides = [1, 1]} : vector<16x96xf32> to vector<16x8xf32>
    %112 = vector.shape_cast %111 : vector<16x8xf32> to vector<2x8x8xf32>
    "tpu.trace_start"() <{level = 10 : i32, message = "bqd,bkd->bqk"}> : () -> ()
    %cst_31 = arith.constant dense<0.000000e+00> : vector<2x8x8xf32>
    %113 = tpu.matmul %108, %110, %cst_31 {dimension_numbers = #tpu.dot_dimension_numbers<[2], [2], [1], [1], [0, 0, 0, 1, 1, 1], [0], [0]>} : vector<2x8x8xf32>, vector<2x8x8xf32>, vector<2x8x8xf32> -> vector<2x8x8xf32>
    "tpu.trace_stop"() : () -> ()
    %cst_32 = arith.constant 0.353553385 : f32
    %114 = vector.broadcast %cst_32 : f32 to vector<2x8x8xf32>
    %115 = arith.mulf %113, %114 : vector<2x8x8xf32>
    %116 = vector.broadcast %6 : vector<2x1x8xf32> to vector<2x8x8xf32>
    %117 = arith.addf %115, %116 : vector<2x8x8xf32>
    %cst_33 = arith.constant dense<0xFF800000> : vector<2x8xf32>
    %118 = vector.multi_reduction <maximumf>, %117, %cst_33 [2] : vector<2x8x8xf32> to vector<2x8xf32>
    %119 = vector.shape_cast %118 : vector<2x8xf32> to vector<2x8x1xf32>
    %120 = vector.broadcast %119 : vector<2x8x1xf32> to vector<2x8x8xf32>
    %121 = arith.subf %117, %120 : vector<2x8x8xf32>
    %122 = math.exp %121 : vector<2x8x8xf32>
    %cst_34 = arith.constant dense<0.000000e+00> : vector<2x8xf32>
    %123 = vector.multi_reduction <add>, %122, %cst_34 [2] : vector<2x8x8xf32> to vector<2x8xf32>
    %124 = vector.shape_cast %123 : vector<2x8xf32> to vector<2x8x1xf32>
    %125 = tpu.reciprocal %124 {approx = true} : vector<2x8x1xf32> -> vector<2x8x1xf32>
    %126 = vector.broadcast %125 : vector<2x8x1xf32> to vector<2x8x8xf32>
    %127 = arith.mulf %122, %126 : vector<2x8x8xf32>
    "tpu.trace_start"() <{level = 10 : i32, message = "bqk,bkd->bqd"}> : () -> ()
    %cst_35 = arith.constant dense<0.000000e+00> : vector<2x8x8xf32>
    %128 = tpu.matmul %127, %112, %cst_35 {dimension_numbers = #tpu.dot_dimension_numbers<[2], [1], [1], [2], [0, 0, 0, 1, 1, 2], [0], [0]>} : vector<2x8x8xf32>, vector<2x8x8xf32>, vector<2x8x8xf32> -> vector<2x8x8xf32>
    "tpu.trace_stop"() : () -> ()
    %129 = vector.shape_cast %128 : vector<2x8x8xf32> to vector<16x8xf32>
    %130 = tpu.concatenate %60, %83, %106, %129 in 1 : vector<16x8xf32>, vector<16x8xf32>, vector<16x8xf32>, vector<16x8xf32> -> vector<16x32xf32>
    %c0_36 = arith.constant 0 : index
    %c32 = arith.constant 32 : index
    %c0_37 = arith.constant 0 : index
    %131 = vector.load %arg3[%c0_36, %c32, %c0_37] : memref<1x352x96xbf16, #tpu.memory_space<vmem>>, vector<1x32x96xbf16>
    %132 = vector.shape_cast %131 : vector<1x32x96xbf16> to vector<32x96xbf16>
    %133 = vector.extract_strided_slice %132 {offsets = [0, 0], sizes = [32, 32], strides = [1, 1]} : vector<32x96xbf16> to vector<32x32xbf16>
    %134 = arith.truncf %130 : vector<16x32xf32> to vector<16x32xbf16>
    %cst_38 = arith.constant dense<0.000000e+00> : vector<16x32xf32>
    %135 = tpu.matmul %134, %133, %cst_38 {dimension_numbers = #tpu.dot_dimension_numbers<[1], [0], [0], [1], [0, 0, 1, 1], [], []>} : vector<16x32xbf16>, vector<32x32xbf16>, vector<16x32xf32> -> vector<16x32xf32>
    %136 = vector.extract_strided_slice %3 {offsets = [3, 0], sizes = [1, 32], strides = [1, 1]} : vector<19x96xf32> to vector<1x32xf32>
    %137 = vector.broadcast %136 : vector<1x32xf32> to vector<16x32xf32>
    %138 = arith.addf %135, %137 : vector<16x32xf32>
    %139 = arith.addf %30, %138 : vector<16x32xf32>
    %140 = vector.extract_strided_slice %3 {offsets = [4, 0], sizes = [1, 32], strides = [1, 1]} : vector<19x96xf32> to vector<1x32xf32>
    %141 = vector.extract_strided_slice %3 {offsets = [5, 0], sizes = [1, 32], strides = [1, 1]} : vector<19x96xf32> to vector<1x32xf32>
    %cst_39 = arith.constant dense<0.000000e+00> : vector<16xf32>
    %142 = vector.multi_reduction <add>, %139, %cst_39 [1] : vector<16x32xf32> to vector<16xf32>
    %143 = vector.shape_cast %142 : vector<16xf32> to vector<16x1xf32>
    %cst_40 = arith.constant 3.200000e+01 : f32
    %144 = vector.broadcast %cst_40 : f32 to vector<16x1xf32>
    %145 = arith.divf %143, %144 : vector<16x1xf32>
    %146 = vector.broadcast %145 : vector<16x1xf32> to vector<16x32xf32>
    %147 = arith.subf %139, %146 : vector<16x32xf32>
    %148 = arith.mulf %147, %147 : vector<16x32xf32>
    %cst_41 = arith.constant dense<0.000000e+00> : vector<16xf32>
    %149 = vector.multi_reduction <add>, %148, %cst_41 [1] : vector<16x32xf32> to vector<16xf32>
    %150 = vector.shape_cast %149 : vector<16xf32> to vector<16x1xf32>
    %cst_42 = arith.constant 3.200000e+01 : f32
    %151 = vector.broadcast %cst_42 : f32 to vector<16x1xf32>
    %152 = arith.divf %150, %151 : vector<16x1xf32>
    %153 = vector.broadcast %145 : vector<16x1xf32> to vector<16x32xf32>
    %154 = arith.subf %139, %153 : vector<16x32xf32>
    %cst_43 = arith.constant 9.99999974E-6 : f32
    %155 = vector.broadcast %cst_43 : f32 to vector<16x1xf32>
    %156 = arith.addf %152, %155 : vector<16x1xf32>
    %157 = math.rsqrt %156 : vector<16x1xf32>
    %158 = vector.broadcast %157 : vector<16x1xf32> to vector<16x32xf32>
    %159 = arith.mulf %154, %158 : vector<16x32xf32>
    %160 = vector.broadcast %140 : vector<1x32xf32> to vector<16x32xf32>
    %161 = arith.mulf %159, %160 : vector<16x32xf32>
    %162 = vector.broadcast %141 : vector<1x32xf32> to vector<16x32xf32>
    %163 = arith.addf %161, %162 : vector<16x32xf32>
    %c0_44 = arith.constant 0 : index
    %c64 = arith.constant 64 : index
    %c0_45 = arith.constant 0 : index
    %164 = vector.load %arg3[%c0_44, %c64, %c0_45] : memref<1x352x96xbf16, #tpu.memory_space<vmem>>, vector<1x32x96xbf16>
    %165 = vector.shape_cast %164 : vector<1x32x96xbf16> to vector<32x96xbf16>
    %166 = vector.extract_strided_slice %165 {offsets = [0, 0], sizes = [32, 64], strides = [1, 1]} : vector<32x96xbf16> to vector<32x64xbf16>
    %167 = arith.truncf %163 : vector<16x32xf32> to vector<16x32xbf16>
    %cst_46 = arith.constant dense<0.000000e+00> : vector<16x64xf32>
    %168 = tpu.matmul %167, %166, %cst_46 {dimension_numbers = #tpu.dot_dimension_numbers<[1], [0], [0], [1], [0, 0, 1, 1], [], []>} : vector<16x32xbf16>, vector<32x64xbf16>, vector<16x64xf32> -> vector<16x64xf32>
    %169 = vector.extract_strided_slice %3 {offsets = [6, 0], sizes = [1, 64], strides = [1, 1]} : vector<19x96xf32> to vector<1x64xf32>
    %170 = vector.broadcast %169 : vector<1x64xf32> to vector<16x64xf32>
    %171 = arith.addf %168, %170 : vector<16x64xf32>
    %172 = arith.mulf %171, %171 : vector<16x64xf32>
    %173 = arith.mulf %171, %172 : vector<16x64xf32>
    %cst_47 = arith.constant 4.471500e-02 : f32
    %174 = vector.broadcast %cst_47 : f32 to vector<16x64xf32>
    %175 = arith.mulf %174, %173 : vector<16x64xf32>
    %176 = arith.addf %171, %175 : vector<16x64xf32>
    %cst_48 = arith.constant 0.797884583 : f32
    %177 = vector.broadcast %cst_48 : f32 to vector<16x64xf32>
    %178 = arith.mulf %177, %176 : vector<16x64xf32>
    %179 = math.tanh %178 : vector<16x64xf32>
    %cst_49 = arith.constant 1.000000e+00 : f32
    %180 = vector.broadcast %cst_49 : f32 to vector<16x64xf32>
    %181 = arith.addf %180, %179 : vector<16x64xf32>
    %cst_50 = arith.constant 5.000000e-01 : f32
    %182 = vector.broadcast %cst_50 : f32 to vector<16x64xf32>
    %183 = arith.mulf %182, %181 : vector<16x64xf32>
    %184 = arith.mulf %171, %183 : vector<16x64xf32>
    %c0_51 = arith.constant 0 : index
    %c96 = arith.constant 96 : index
    %c0_52 = arith.constant 0 : index
    %185 = vector.load %arg3[%c0_51, %c96, %c0_52] : memref<1x352x96xbf16, #tpu.memory_space<vmem>>, vector<1x64x96xbf16>
    %186 = vector.shape_cast %185 : vector<1x64x96xbf16> to vector<64x96xbf16>
    %187 = vector.extract_strided_slice %186 {offsets = [0, 0], sizes = [64, 32], strides = [1, 1]} : vector<64x96xbf16> to vector<64x32xbf16>
    %188 = arith.truncf %184 : vector<16x64xf32> to vector<16x64xbf16>
    %cst_53 = arith.constant dense<0.000000e+00> : vector<16x32xf32>
    %189 = tpu.matmul %188, %187, %cst_53 {dimension_numbers = #tpu.dot_dimension_numbers<[1], [0], [0], [1], [0, 0, 1, 1], [], []>} : vector<16x64xbf16>, vector<64x32xbf16>, vector<16x32xf32> -> vector<16x32xf32>
    %190 = vector.extract_strided_slice %3 {offsets = [7, 0], sizes = [1, 32], strides = [1, 1]} : vector<19x96xf32> to vector<1x32xf32>
    %191 = vector.broadcast %190 : vector<1x32xf32> to vector<16x32xf32>
    %192 = arith.addf %189, %191 : vector<16x32xf32>
    %193 = arith.addf %163, %192 : vector<16x32xf32>
    %194 = vector.extract_strided_slice %3 {offsets = [8, 0], sizes = [1, 32], strides = [1, 1]} : vector<19x96xf32> to vector<1x32xf32>
    %195 = vector.extract_strided_slice %3 {offsets = [9, 0], sizes = [1, 32], strides = [1, 1]} : vector<19x96xf32> to vector<1x32xf32>
    %cst_54 = arith.constant dense<0.000000e+00> : vector<16xf32>
    %196 = vector.multi_reduction <add>, %193, %cst_54 [1] : vector<16x32xf32> to vector<16xf32>
    %197 = vector.shape_cast %196 : vector<16xf32> to vector<16x1xf32>
    %cst_55 = arith.constant 3.200000e+01 : f32
    %198 = vector.broadcast %cst_55 : f32 to vector<16x1xf32>
    %199 = arith.divf %197, %198 : vector<16x1xf32>
    %200 = vector.broadcast %199 : vector<16x1xf32> to vector<16x32xf32>
    %201 = arith.subf %193, %200 : vector<16x32xf32>
    %202 = arith.mulf %201, %201 : vector<16x32xf32>
    %cst_56 = arith.constant dense<0.000000e+00> : vector<16xf32>
    %203 = vector.multi_reduction <add>, %202, %cst_56 [1] : vector<16x32xf32> to vector<16xf32>
    %204 = vector.shape_cast %203 : vector<16xf32> to vector<16x1xf32>
    %cst_57 = arith.constant 3.200000e+01 : f32
    %205 = vector.broadcast %cst_57 : f32 to vector<16x1xf32>
    %206 = arith.divf %204, %205 : vector<16x1xf32>
    %207 = vector.broadcast %199 : vector<16x1xf32> to vector<16x32xf32>
    %208 = arith.subf %193, %207 : vector<16x32xf32>
    %cst_58 = arith.constant 9.99999974E-6 : f32
    %209 = vector.broadcast %cst_58 : f32 to vector<16x1xf32>
    %210 = arith.addf %206, %209 : vector<16x1xf32>
    %211 = math.rsqrt %210 : vector<16x1xf32>
    %212 = vector.broadcast %211 : vector<16x1xf32> to vector<16x32xf32>
    %213 = arith.mulf %208, %212 : vector<16x32xf32>
    %214 = vector.broadcast %194 : vector<1x32xf32> to vector<16x32xf32>
    %215 = arith.mulf %213, %214 : vector<16x32xf32>
    %216 = vector.broadcast %195 : vector<1x32xf32> to vector<16x32xf32>
    %217 = arith.addf %215, %216 : vector<16x32xf32>
    %c0_59 = arith.constant 0 : index
    %c160 = arith.constant 160 : index
    %c0_60 = arith.constant 0 : index
    %218 = vector.load %arg3[%c0_59, %c160, %c0_60] : memref<1x352x96xbf16, #tpu.memory_space<vmem>>, vector<1x32x96xbf16>
    %219 = vector.shape_cast %218 : vector<1x32x96xbf16> to vector<32x96xbf16>
    %220 = arith.truncf %217 : vector<16x32xf32> to vector<16x32xbf16>
    %cst_61 = arith.constant dense<0.000000e+00> : vector<16x96xf32>
    %221 = tpu.matmul %220, %219, %cst_61 {dimension_numbers = #tpu.dot_dimension_numbers<[1], [0], [0], [1], [0, 0, 1, 1], [], []>} : vector<16x32xbf16>, vector<32x96xbf16>, vector<16x96xf32> -> vector<16x96xf32>
    %222 = vector.extract_strided_slice %3 {offsets = [10, 0], sizes = [1, 96], strides = [1, 1]} : vector<19x96xf32> to vector<1x96xf32>
    %223 = vector.broadcast %222 : vector<1x96xf32> to vector<16x96xf32>
    %224 = arith.addf %221, %223 : vector<16x96xf32>
    %225 = vector.extract_strided_slice %224 {offsets = [0, 0], sizes = [16, 8], strides = [1, 1]} : vector<16x96xf32> to vector<16x8xf32>
    %226 = vector.shape_cast %225 : vector<16x8xf32> to vector<2x8x8xf32>
    %227 = vector.extract_strided_slice %224 {offsets = [0, 32], sizes = [16, 8], strides = [1, 1]} : vector<16x96xf32> to vector<16x8xf32>
    %228 = vector.shape_cast %227 : vector<16x8xf32> to vector<2x8x8xf32>
    %229 = vector.extract_strided_slice %224 {offsets = [0, 64], sizes = [16, 8], strides = [1, 1]} : vector<16x96xf32> to vector<16x8xf32>
    %230 = vector.shape_cast %229 : vector<16x8xf32> to vector<2x8x8xf32>
    "tpu.trace_start"() <{level = 10 : i32, message = "bqd,bkd->bqk"}> : () -> ()
    %cst_62 = arith.constant dense<0.000000e+00> : vector<2x8x8xf32>
    %231 = tpu.matmul %226, %228, %cst_62 {dimension_numbers = #tpu.dot_dimension_numbers<[2], [2], [1], [1], [0, 0, 0, 1, 1, 1], [0], [0]>} : vector<2x8x8xf32>, vector<2x8x8xf32>, vector<2x8x8xf32> -> vector<2x8x8xf32>
    "tpu.trace_stop"() : () -> ()
    %cst_63 = arith.constant 0.353553385 : f32
    %232 = vector.broadcast %cst_63 : f32 to vector<2x8x8xf32>
    %233 = arith.mulf %231, %232 : vector<2x8x8xf32>
    %234 = vector.broadcast %6 : vector<2x1x8xf32> to vector<2x8x8xf32>
    %235 = arith.addf %233, %234 : vector<2x8x8xf32>
    %cst_64 = arith.constant dense<0xFF800000> : vector<2x8xf32>
    %236 = vector.multi_reduction <maximumf>, %235, %cst_64 [2] : vector<2x8x8xf32> to vector<2x8xf32>
    %237 = vector.shape_cast %236 : vector<2x8xf32> to vector<2x8x1xf32>
    %238 = vector.broadcast %237 : vector<2x8x1xf32> to vector<2x8x8xf32>
    %239 = arith.subf %235, %238 : vector<2x8x8xf32>
    %240 = math.exp %239 : vector<2x8x8xf32>
    %cst_65 = arith.constant dense<0.000000e+00> : vector<2x8xf32>
    %241 = vector.multi_reduction <add>, %240, %cst_65 [2] : vector<2x8x8xf32> to vector<2x8xf32>
    %242 = vector.shape_cast %241 : vector<2x8xf32> to vector<2x8x1xf32>
    %243 = tpu.reciprocal %242 {approx = true} : vector<2x8x1xf32> -> vector<2x8x1xf32>
    %244 = vector.broadcast %243 : vector<2x8x1xf32> to vector<2x8x8xf32>
    %245 = arith.mulf %240, %244 : vector<2x8x8xf32>
    "tpu.trace_start"() <{level = 10 : i32, message = "bqk,bkd->bqd"}> : () -> ()
    %cst_66 = arith.constant dense<0.000000e+00> : vector<2x8x8xf32>
    %246 = tpu.matmul %245, %230, %cst_66 {dimension_numbers = #tpu.dot_dimension_numbers<[2], [1], [1], [2], [0, 0, 0, 1, 1, 2], [0], [0]>} : vector<2x8x8xf32>, vector<2x8x8xf32>, vector<2x8x8xf32> -> vector<2x8x8xf32>
    "tpu.trace_stop"() : () -> ()
    %247 = vector.shape_cast %246 : vector<2x8x8xf32> to vector<16x8xf32>
    %248 = vector.extract_strided_slice %224 {offsets = [0, 8], sizes = [16, 8], strides = [1, 1]} : vector<16x96xf32> to vector<16x8xf32>
    %249 = vector.shape_cast %248 : vector<16x8xf32> to vector<2x8x8xf32>
    %250 = vector.extract_strided_slice %224 {offsets = [0, 40], sizes = [16, 8], strides = [1, 1]} : vector<16x96xf32> to vector<16x8xf32>
    %251 = vector.shape_cast %250 : vector<16x8xf32> to vector<2x8x8xf32>
    %252 = vector.extract_strided_slice %224 {offsets = [0, 72], sizes = [16, 8], strides = [1, 1]} : vector<16x96xf32> to vector<16x8xf32>
    %253 = vector.shape_cast %252 : vector<16x8xf32> to vector<2x8x8xf32>
    "tpu.trace_start"() <{level = 10 : i32, message = "bqd,bkd->bqk"}> : () -> ()
    %cst_67 = arith.constant dense<0.000000e+00> : vector<2x8x8xf32>
    %254 = tpu.matmul %249, %251, %cst_67 {dimension_numbers = #tpu.dot_dimension_numbers<[2], [2], [1], [1], [0, 0, 0, 1, 1, 1], [0], [0]>} : vector<2x8x8xf32>, vector<2x8x8xf32>, vector<2x8x8xf32> -> vector<2x8x8xf32>
    "tpu.trace_stop"() : () -> ()
    %cst_68 = arith.constant 0.353553385 : f32
    %255 = vector.broadcast %cst_68 : f32 to vector<2x8x8xf32>
    %256 = arith.mulf %254, %255 : vector<2x8x8xf32>
    %257 = vector.broadcast %6 : vector<2x1x8xf32> to vector<2x8x8xf32>
    %258 = arith.addf %256, %257 : vector<2x8x8xf32>
    %cst_69 = arith.constant dense<0xFF800000> : vector<2x8xf32>
    %259 = vector.multi_reduction <maximumf>, %258, %cst_69 [2] : vector<2x8x8xf32> to vector<2x8xf32>
    %260 = vector.shape_cast %259 : vector<2x8xf32> to vector<2x8x1xf32>
    %261 = vector.broadcast %260 : vector<2x8x1xf32> to vector<2x8x8xf32>
    %262 = arith.subf %258, %261 : vector<2x8x8xf32>
    %263 = math.exp %262 : vector<2x8x8xf32>
    %cst_70 = arith.constant dense<0.000000e+00> : vector<2x8xf32>
    %264 = vector.multi_reduction <add>, %263, %cst_70 [2] : vector<2x8x8xf32> to vector<2x8xf32>
    %265 = vector.shape_cast %264 : vector<2x8xf32> to vector<2x8x1xf32>
    %266 = tpu.reciprocal %265 {approx = true} : vector<2x8x1xf32> -> vector<2x8x1xf32>
    %267 = vector.broadcast %266 : vector<2x8x1xf32> to vector<2x8x8xf32>
    %268 = arith.mulf %263, %267 : vector<2x8x8xf32>
    "tpu.trace_start"() <{level = 10 : i32, message = "bqk,bkd->bqd"}> : () -> ()
    %cst_71 = arith.constant dense<0.000000e+00> : vector<2x8x8xf32>
    %269 = tpu.matmul %268, %253, %cst_71 {dimension_numbers = #tpu.dot_dimension_numbers<[2], [1], [1], [2], [0, 0, 0, 1, 1, 2], [0], [0]>} : vector<2x8x8xf32>, vector<2x8x8xf32>, vector<2x8x8xf32> -> vector<2x8x8xf32>
    "tpu.trace_stop"() : () -> ()
    %270 = vector.shape_cast %269 : vector<2x8x8xf32> to vector<16x8xf32>
    %271 = vector.extract_strided_slice %224 {offsets = [0, 16], sizes = [16, 8], strides = [1, 1]} : vector<16x96xf32> to vector<16x8xf32>
    %272 = vector.shape_cast %271 : vector<16x8xf32> to vector<2x8x8xf32>
    %273 = vector.extract_strided_slice %224 {offsets = [0, 48], sizes = [16, 8], strides = [1, 1]} : vector<16x96xf32> to vector<16x8xf32>
    %274 = vector.shape_cast %273 : vector<16x8xf32> to vector<2x8x8xf32>
    %275 = vector.extract_strided_slice %224 {offsets = [0, 80], sizes = [16, 8], strides = [1, 1]} : vector<16x96xf32> to vector<16x8xf32>
    %276 = vector.shape_cast %275 : vector<16x8xf32> to vector<2x8x8xf32>
    "tpu.trace_start"() <{level = 10 : i32, message = "bqd,bkd->bqk"}> : () -> ()
    %cst_72 = arith.constant dense<0.000000e+00> : vector<2x8x8xf32>
    %277 = tpu.matmul %272, %274, %cst_72 {dimension_numbers = #tpu.dot_dimension_numbers<[2], [2], [1], [1], [0, 0, 0, 1, 1, 1], [0], [0]>} : vector<2x8x8xf32>, vector<2x8x8xf32>, vector<2x8x8xf32> -> vector<2x8x8xf32>
    "tpu.trace_stop"() : () -> ()
    %cst_73 = arith.constant 0.353553385 : f32
    %278 = vector.broadcast %cst_73 : f32 to vector<2x8x8xf32>
    %279 = arith.mulf %277, %278 : vector<2x8x8xf32>
    %280 = vector.broadcast %6 : vector<2x1x8xf32> to vector<2x8x8xf32>
    %281 = arith.addf %279, %280 : vector<2x8x8xf32>
    %cst_74 = arith.constant dense<0xFF800000> : vector<2x8xf32>
    %282 = vector.multi_reduction <maximumf>, %281, %cst_74 [2] : vector<2x8x8xf32> to vector<2x8xf32>
    %283 = vector.shape_cast %282 : vector<2x8xf32> to vector<2x8x1xf32>
    %284 = vector.broadcast %283 : vector<2x8x1xf32> to vector<2x8x8xf32>
    %285 = arith.subf %281, %284 : vector<2x8x8xf32>
    %286 = math.exp %285 : vector<2x8x8xf32>
    %cst_75 = arith.constant dense<0.000000e+00> : vector<2x8xf32>
    %287 = vector.multi_reduction <add>, %286, %cst_75 [2] : vector<2x8x8xf32> to vector<2x8xf32>
    %288 = vector.shape_cast %287 : vector<2x8xf32> to vector<2x8x1xf32>
    %289 = tpu.reciprocal %288 {approx = true} : vector<2x8x1xf32> -> vector<2x8x1xf32>
    %290 = vector.broadcast %289 : vector<2x8x1xf32> to vector<2x8x8xf32>
    %291 = arith.mulf %286, %290 : vector<2x8x8xf32>
    "tpu.trace_start"() <{level = 10 : i32, message = "bqk,bkd->bqd"}> : () -> ()
    %cst_76 = arith.constant dense<0.000000e+00> : vector<2x8x8xf32>
    %292 = tpu.matmul %291, %276, %cst_76 {dimension_numbers = #tpu.dot_dimension_numbers<[2], [1], [1], [2], [0, 0, 0, 1, 1, 2], [0], [0]>} : vector<2x8x8xf32>, vector<2x8x8xf32>, vector<2x8x8xf32> -> vector<2x8x8xf32>
    "tpu.trace_stop"() : () -> ()
    %293 = vector.shape_cast %292 : vector<2x8x8xf32> to vector<16x8xf32>
    %294 = vector.extract_strided_slice %224 {offsets = [0, 24], sizes = [16, 8], strides = [1, 1]} : vector<16x96xf32> to vector<16x8xf32>
    %295 = vector.shape_cast %294 : vector<16x8xf32> to vector<2x8x8xf32>
    %296 = vector.extract_strided_slice %224 {offsets = [0, 56], sizes = [16, 8], strides = [1, 1]} : vector<16x96xf32> to vector<16x8xf32>
    %297 = vector.shape_cast %296 : vector<16x8xf32> to vector<2x8x8xf32>
    %298 = vector.extract_strided_slice %224 {offsets = [0, 88], sizes = [16, 8], strides = [1, 1]} : vector<16x96xf32> to vector<16x8xf32>
    %299 = vector.shape_cast %298 : vector<16x8xf32> to vector<2x8x8xf32>
    "tpu.trace_start"() <{level = 10 : i32, message = "bqd,bkd->bqk"}> : () -> ()
    %cst_77 = arith.constant dense<0.000000e+00> : vector<2x8x8xf32>
    %300 = tpu.matmul %295, %297, %cst_77 {dimension_numbers = #tpu.dot_dimension_numbers<[2], [2], [1], [1], [0, 0, 0, 1, 1, 1], [0], [0]>} : vector<2x8x8xf32>, vector<2x8x8xf32>, vector<2x8x8xf32> -> vector<2x8x8xf32>
    "tpu.trace_stop"() : () -> ()
    %cst_78 = arith.constant 0.353553385 : f32
    %301 = vector.broadcast %cst_78 : f32 to vector<2x8x8xf32>
    %302 = arith.mulf %300, %301 : vector<2x8x8xf32>
    %303 = vector.broadcast %6 : vector<2x1x8xf32> to vector<2x8x8xf32>
    %304 = arith.addf %302, %303 : vector<2x8x8xf32>
    %cst_79 = arith.constant dense<0xFF800000> : vector<2x8xf32>
    %305 = vector.multi_reduction <maximumf>, %304, %cst_79 [2] : vector<2x8x8xf32> to vector<2x8xf32>
    %306 = vector.shape_cast %305 : vector<2x8xf32> to vector<2x8x1xf32>
    %307 = vector.broadcast %306 : vector<2x8x1xf32> to vector<2x8x8xf32>
    %308 = arith.subf %304, %307 : vector<2x8x8xf32>
    %309 = math.exp %308 : vector<2x8x8xf32>
    %cst_80 = arith.constant dense<0.000000e+00> : vector<2x8xf32>
    %310 = vector.multi_reduction <add>, %309, %cst_80 [2] : vector<2x8x8xf32> to vector<2x8xf32>
    %311 = vector.shape_cast %310 : vector<2x8xf32> to vector<2x8x1xf32>
    %312 = tpu.reciprocal %311 {approx = true} : vector<2x8x1xf32> -> vector<2x8x1xf32>
    %313 = vector.broadcast %312 : vector<2x8x1xf32> to vector<2x8x8xf32>
    %314 = arith.mulf %309, %313 : vector<2x8x8xf32>
    "tpu.trace_start"() <{level = 10 : i32, message = "bqk,bkd->bqd"}> : () -> ()
    %cst_81 = arith.constant dense<0.000000e+00> : vector<2x8x8xf32>
    %315 = tpu.matmul %314, %299, %cst_81 {dimension_numbers = #tpu.dot_dimension_numbers<[2], [1], [1], [2], [0, 0, 0, 1, 1, 2], [0], [0]>} : vector<2x8x8xf32>, vector<2x8x8xf32>, vector<2x8x8xf32> -> vector<2x8x8xf32>
    "tpu.trace_stop"() : () -> ()
    %316 = vector.shape_cast %315 : vector<2x8x8xf32> to vector<16x8xf32>
    %317 = tpu.concatenate %247, %270, %293, %316 in 1 : vector<16x8xf32>, vector<16x8xf32>, vector<16x8xf32>, vector<16x8xf32> -> vector<16x32xf32>
    %c0_82 = arith.constant 0 : index
    %c192 = arith.constant 192 : index
    %c0_83 = arith.constant 0 : index
    %318 = vector.load %arg3[%c0_82, %c192, %c0_83] : memref<1x352x96xbf16, #tpu.memory_space<vmem>>, vector<1x32x96xbf16>
    %319 = vector.shape_cast %318 : vector<1x32x96xbf16> to vector<32x96xbf16>
    %320 = vector.extract_strided_slice %319 {offsets = [0, 0], sizes = [32, 32], strides = [1, 1]} : vector<32x96xbf16> to vector<32x32xbf16>
    %321 = arith.truncf %317 : vector<16x32xf32> to vector<16x32xbf16>
    %cst_84 = arith.constant dense<0.000000e+00> : vector<16x32xf32>
    %322 = tpu.matmul %321, %320, %cst_84 {dimension_numbers = #tpu.dot_dimension_numbers<[1], [0], [0], [1], [0, 0, 1, 1], [], []>} : vector<16x32xbf16>, vector<32x32xbf16>, vector<16x32xf32> -> vector<16x32xf32>
    %323 = vector.extract_strided_slice %3 {offsets = [11, 0], sizes = [1, 32], strides = [1, 1]} : vector<19x96xf32> to vector<1x32xf32>
    %324 = vector.broadcast %323 : vector<1x32xf32> to vector<16x32xf32>
    %325 = arith.addf %322, %324 : vector<16x32xf32>
    %326 = arith.addf %217, %325 : vector<16x32xf32>
    %327 = vector.extract_strided_slice %3 {offsets = [12, 0], sizes = [1, 32], strides = [1, 1]} : vector<19x96xf32> to vector<1x32xf32>
    %328 = vector.extract_strided_slice %3 {offsets = [13, 0], sizes = [1, 32], strides = [1, 1]} : vector<19x96xf32> to vector<1x32xf32>
    %cst_85 = arith.constant dense<0.000000e+00> : vector<16xf32>
    %329 = vector.multi_reduction <add>, %326, %cst_85 [1] : vector<16x32xf32> to vector<16xf32>
    %330 = vector.shape_cast %329 : vector<16xf32> to vector<16x1xf32>
    %cst_86 = arith.constant 3.200000e+01 : f32
    %331 = vector.broadcast %cst_86 : f32 to vector<16x1xf32>
    %332 = arith.divf %330, %331 : vector<16x1xf32>
    %333 = vector.broadcast %332 : vector<16x1xf32> to vector<16x32xf32>
    %334 = arith.subf %326, %333 : vector<16x32xf32>
    %335 = arith.mulf %334, %334 : vector<16x32xf32>
    %cst_87 = arith.constant dense<0.000000e+00> : vector<16xf32>
    %336 = vector.multi_reduction <add>, %335, %cst_87 [1] : vector<16x32xf32> to vector<16xf32>
    %337 = vector.shape_cast %336 : vector<16xf32> to vector<16x1xf32>
    %cst_88 = arith.constant 3.200000e+01 : f32
    %338 = vector.broadcast %cst_88 : f32 to vector<16x1xf32>
    %339 = arith.divf %337, %338 : vector<16x1xf32>
    %340 = vector.broadcast %332 : vector<16x1xf32> to vector<16x32xf32>
    %341 = arith.subf %326, %340 : vector<16x32xf32>
    %cst_89 = arith.constant 9.99999974E-6 : f32
    %342 = vector.broadcast %cst_89 : f32 to vector<16x1xf32>
    %343 = arith.addf %339, %342 : vector<16x1xf32>
    %344 = math.rsqrt %343 : vector<16x1xf32>
    %345 = vector.broadcast %344 : vector<16x1xf32> to vector<16x32xf32>
    %346 = arith.mulf %341, %345 : vector<16x32xf32>
    %347 = vector.broadcast %327 : vector<1x32xf32> to vector<16x32xf32>
    %348 = arith.mulf %346, %347 : vector<16x32xf32>
    %349 = vector.broadcast %328 : vector<1x32xf32> to vector<16x32xf32>
    %350 = arith.addf %348, %349 : vector<16x32xf32>
    %c0_90 = arith.constant 0 : index
    %c224 = arith.constant 224 : index
    %c0_91 = arith.constant 0 : index
    %351 = vector.load %arg3[%c0_90, %c224, %c0_91] : memref<1x352x96xbf16, #tpu.memory_space<vmem>>, vector<1x32x96xbf16>
    %352 = vector.shape_cast %351 : vector<1x32x96xbf16> to vector<32x96xbf16>
    %353 = vector.extract_strided_slice %352 {offsets = [0, 0], sizes = [32, 64], strides = [1, 1]} : vector<32x96xbf16> to vector<32x64xbf16>
    %354 = arith.truncf %350 : vector<16x32xf32> to vector<16x32xbf16>
    %cst_92 = arith.constant dense<0.000000e+00> : vector<16x64xf32>
    %355 = tpu.matmul %354, %353, %cst_92 {dimension_numbers = #tpu.dot_dimension_numbers<[1], [0], [0], [1], [0, 0, 1, 1], [], []>} : vector<16x32xbf16>, vector<32x64xbf16>, vector<16x64xf32> -> vector<16x64xf32>
    %356 = vector.extract_strided_slice %3 {offsets = [14, 0], sizes = [1, 64], strides = [1, 1]} : vector<19x96xf32> to vector<1x64xf32>
    %357 = vector.broadcast %356 : vector<1x64xf32> to vector<16x64xf32>
    %358 = arith.addf %355, %357 : vector<16x64xf32>
    %359 = arith.mulf %358, %358 : vector<16x64xf32>
    %360 = arith.mulf %358, %359 : vector<16x64xf32>
    %cst_93 = arith.constant 4.471500e-02 : f32
    %361 = vector.broadcast %cst_93 : f32 to vector<16x64xf32>
    %362 = arith.mulf %361, %360 : vector<16x64xf32>
    %363 = arith.addf %358, %362 : vector<16x64xf32>
    %cst_94 = arith.constant 0.797884583 : f32
    %364 = vector.broadcast %cst_94 : f32 to vector<16x64xf32>
    %365 = arith.mulf %364, %363 : vector<16x64xf32>
    %366 = math.tanh %365 : vector<16x64xf32>
    %cst_95 = arith.constant 1.000000e+00 : f32
    %367 = vector.broadcast %cst_95 : f32 to vector<16x64xf32>
    %368 = arith.addf %367, %366 : vector<16x64xf32>
    %cst_96 = arith.constant 5.000000e-01 : f32
    %369 = vector.broadcast %cst_96 : f32 to vector<16x64xf32>
    %370 = arith.mulf %369, %368 : vector<16x64xf32>
    %371 = arith.mulf %358, %370 : vector<16x64xf32>
    %c0_97 = arith.constant 0 : index
    %c256 = arith.constant 256 : index
    %c0_98 = arith.constant 0 : index
    %372 = vector.load %arg3[%c0_97, %c256, %c0_98] : memref<1x352x96xbf16, #tpu.memory_space<vmem>>, vector<1x64x96xbf16>
    %373 = vector.shape_cast %372 : vector<1x64x96xbf16> to vector<64x96xbf16>
    %374 = vector.extract_strided_slice %373 {offsets = [0, 0], sizes = [64, 32], strides = [1, 1]} : vector<64x96xbf16> to vector<64x32xbf16>
    %375 = arith.truncf %371 : vector<16x64xf32> to vector<16x64xbf16>
    %cst_99 = arith.constant dense<0.000000e+00> : vector<16x32xf32>
    %376 = tpu.matmul %375, %374, %cst_99 {dimension_numbers = #tpu.dot_dimension_numbers<[1], [0], [0], [1], [0, 0, 1, 1], [], []>} : vector<16x64xbf16>, vector<64x32xbf16>, vector<16x32xf32> -> vector<16x32xf32>
    %377 = vector.extract_strided_slice %3 {offsets = [15, 0], sizes = [1, 32], strides = [1, 1]} : vector<19x96xf32> to vector<1x32xf32>
    %378 = vector.broadcast %377 : vector<1x32xf32> to vector<16x32xf32>
    %379 = arith.addf %376, %378 : vector<16x32xf32>
    %380 = arith.addf %350, %379 : vector<16x32xf32>
    %381 = vector.extract_strided_slice %3 {offsets = [16, 0], sizes = [1, 32], strides = [1, 1]} : vector<19x96xf32> to vector<1x32xf32>
    %382 = vector.extract_strided_slice %3 {offsets = [17, 0], sizes = [1, 32], strides = [1, 1]} : vector<19x96xf32> to vector<1x32xf32>
    %cst_100 = arith.constant dense<0.000000e+00> : vector<16xf32>
    %383 = vector.multi_reduction <add>, %380, %cst_100 [1] : vector<16x32xf32> to vector<16xf32>
    %384 = vector.shape_cast %383 : vector<16xf32> to vector<16x1xf32>
    %cst_101 = arith.constant 3.200000e+01 : f32
    %385 = vector.broadcast %cst_101 : f32 to vector<16x1xf32>
    %386 = arith.divf %384, %385 : vector<16x1xf32>
    %387 = vector.broadcast %386 : vector<16x1xf32> to vector<16x32xf32>
    %388 = arith.subf %380, %387 : vector<16x32xf32>
    %389 = arith.mulf %388, %388 : vector<16x32xf32>
    %cst_102 = arith.constant dense<0.000000e+00> : vector<16xf32>
    %390 = vector.multi_reduction <add>, %389, %cst_102 [1] : vector<16x32xf32> to vector<16xf32>
    %391 = vector.shape_cast %390 : vector<16xf32> to vector<16x1xf32>
    %cst_103 = arith.constant 3.200000e+01 : f32
    %392 = vector.broadcast %cst_103 : f32 to vector<16x1xf32>
    %393 = arith.divf %391, %392 : vector<16x1xf32>
    %394 = vector.broadcast %386 : vector<16x1xf32> to vector<16x32xf32>
    %395 = arith.subf %380, %394 : vector<16x32xf32>
    %cst_104 = arith.constant 9.99999974E-6 : f32
    %396 = vector.broadcast %cst_104 : f32 to vector<16x1xf32>
    %397 = arith.addf %393, %396 : vector<16x1xf32>
    %398 = math.rsqrt %397 : vector<16x1xf32>
    %399 = vector.broadcast %398 : vector<16x1xf32> to vector<16x32xf32>
    %400 = arith.mulf %395, %399 : vector<16x32xf32>
    %401 = vector.broadcast %381 : vector<1x32xf32> to vector<16x32xf32>
    %402 = arith.mulf %400, %401 : vector<16x32xf32>
    %403 = vector.broadcast %382 : vector<1x32xf32> to vector<16x32xf32>
    %404 = arith.addf %402, %403 : vector<16x32xf32>
    %405 = vector.shape_cast %404 : vector<16x32xf32> to vector<2x8x32xf32>
    %406 = vector.extract_strided_slice %405 {offsets = [0, 0, 0], sizes = [2, 1, 32], strides = [1, 1, 1]} : vector<2x8x32xf32> to vector<2x1x32xf32>
    %407 = vector.shape_cast %406 : vector<2x1x32xf32> to vector<2x32xf32>
    %c0_105 = arith.constant 0 : index
    %c320 = arith.constant 320 : index
    %c0_106 = arith.constant 0 : index
    %408 = vector.load %arg3[%c0_105, %c320, %c0_106] : memref<1x352x96xbf16, #tpu.memory_space<vmem>>, vector<1x32x96xbf16>
    %409 = vector.shape_cast %408 : vector<1x32x96xbf16> to vector<32x96xbf16>
    %410 = vector.extract_strided_slice %409 {offsets = [0, 0], sizes = [32, 32], strides = [1, 1]} : vector<32x96xbf16> to vector<32x32xbf16>
    %411 = arith.truncf %407 : vector<2x32xf32> to vector<2x32xbf16>
    %cst_107 = arith.constant dense<0.000000e+00> : vector<2x32xf32>
    %412 = tpu.matmul %411, %410, %cst_107 {dimension_numbers = #tpu.dot_dimension_numbers<[1], [0], [0], [1], [0, 0, 1, 1], [], []>} : vector<2x32xbf16>, vector<32x32xbf16>, vector<2x32xf32> -> vector<2x32xf32>
    %413 = vector.extract_strided_slice %3 {offsets = [18, 0], sizes = [1, 32], strides = [1, 1]} : vector<19x96xf32> to vector<1x32xf32>
    %414 = vector.broadcast %413 : vector<1x32xf32> to vector<2x32xf32>
    %415 = arith.addf %412, %414 : vector<2x32xf32>
    %416 = math.tanh %415 : vector<2x32xf32>
    %c0_108 = arith.constant 0 : index
    %c0_109 = arith.constant 0 : index
    %c0_110 = arith.constant 0 : index
    %417 = vector.load %arg6[%c0_108, %c0_109, %c0_110] : memref<1x2x32xf32, #tpu.memory_space<vmem>>, vector<1x2x32xf32>
    %418 = vector.shape_cast %417 : vector<1x2x32xf32> to vector<2x32xf32>
    %419 = vector.shape_cast %416 : vector<2x32xf32> to vector<1x2x32xf32>
    tpu.vector_store %arg6[%c0_108, %c0_109, %c0_110], %419 {strides = array<i32>} : memref<1x2x32xf32, #tpu.memory_space<vmem>>, vector<1x2x32xf32>,
    %c0_i32 = arith.constant 0 : i32
    %420 = arith.cmpi eq, %arg0, %c0_i32 : i32
    %421 = arith.extui %420 : i1 to i32
    %c0_i32_111 = arith.constant 0 : i32
    %422 = arith.cmpi ne, %421, %c0_i32_111 : i32
    scf.if %422 {
      %c0_113 = arith.constant 0 : index
      %c0_114 = arith.constant 0 : index
      %426 = vector.load %arg8[%c0_113, %c0_114] : memref<2x32xf32, #tpu.memory_space<vmem>>, vector<2x32xf32>
      tpu.vector_store %arg8[%c0_113, %c0_114], %416 {strides = array<i32>} : memref<2x32xf32, #tpu.memory_space<vmem>>, vector<2x32xf32>,
      %cst_115 = arith.constant 0.000000e+00 : f32
      %427 = vector.broadcast %cst_115 : f32 to vector<1x1xf32>
      %c0_116 = arith.constant 0 : index
      %c0_117 = arith.constant 0 : index
      %428 = vector.load %arg7[%c0_116, %c0_117] : memref<1x1xf32, #tpu.memory_space<vmem>>, vector<1x1xf32>
      tpu.vector_store %arg7[%c0_116, %c0_117], %427 {strides = array<i32>} : memref<1x1xf32, #tpu.memory_space<vmem>>, vector<1x1xf32>,
    } else {
    }
    %c1_i32 = arith.constant 1 : i32
    %423 = arith.cmpi eq, %arg0, %c1_i32 : i32
    %424 = arith.extui %423 : i1 to i32
    %c0_i32_112 = arith.constant 0 : i32
    %425 = arith.cmpi ne, %424, %c0_i32_112 : i32
    scf.if %425 {
      %c0_113 = arith.constant 0 : index
      %c0_114 = arith.constant 0 : index
      %426 = vector.load %arg8[%c0_113, %c0_114] : memref<2x32xf32, #tpu.memory_space<vmem>>, vector<2x32xf32>
      %c0_115 = arith.constant 0 : index
      %c0_116 = arith.constant 0 : index
      %427 = vector.load %arg5[%c0_115, %c0_116] : memref<32x64xf32, #tpu.memory_space<vmem>>, vector<32x64xf32>
      %428 = arith.mulf %426, %426 : vector<2x32xf32>
      %cst_117 = arith.constant dense<0.000000e+00> : vector<2xf32>
      %429 = vector.multi_reduction <add>, %428, %cst_117 [1] : vector<2x32xf32> to vector<2xf32>
      %430 = vector.shape_cast %429 : vector<2xf32> to vector<2x1xf32>
      %431 = math.sqrt %430 : vector<2x1xf32>
      %cst_118 = arith.constant 9.99999993E-9 : f32
      %432 = vector.broadcast %cst_118 : f32 to vector<2x1xf32>
      %433 = arith.maximumf %431, %432 : vector<2x1xf32>
      %434 = arith.mulf %416, %416 : vector<2x32xf32>
      %cst_119 = arith.constant dense<0.000000e+00> : vector<2xf32>
      %435 = vector.multi_reduction <add>, %434, %cst_119 [1] : vector<2x32xf32> to vector<2xf32>
      %436 = vector.shape_cast %435 : vector<2xf32> to vector<2x1xf32>
      %437 = math.sqrt %436 : vector<2x1xf32>
      %cst_120 = arith.constant 9.99999993E-9 : f32
      %438 = vector.broadcast %cst_120 : f32 to vector<2x1xf32>
      %439 = arith.maximumf %437, %438 : vector<2x1xf32>
      %440 = arith.mulf %426, %416 : vector<2x32xf32>
      %cst_121 = arith.constant dense<0.000000e+00> : vector<2xf32>
      %441 = vector.multi_reduction <add>, %440, %cst_121 [1] : vector<2x32xf32> to vector<2xf32>
      %442 = vector.shape_cast %441 : vector<2xf32> to vector<2x1xf32>
      %443 = arith.mulf %433, %439 : vector<2x1xf32>
      %444 = arith.divf %442, %443 : vector<2x1xf32>
      %445 = arith.mulf %427, %427 : vector<32x64xf32>
      %cst_122 = arith.constant dense<0.000000e+00> : vector<64xf32>
      %446 = vector.multi_reduction <add>, %445, %cst_122 [0] : vector<32x64xf32> to vector<64xf32>
      %447 = vector.shape_cast %446 : vector<64xf32> to vector<1x64xf32>
      %448 = math.sqrt %447 : vector<1x64xf32>
      %cst_123 = arith.constant 9.99999993E-9 : f32
      %449 = vector.broadcast %cst_123 : f32 to vector<1x64xf32>
      %450 = arith.maximumf %448, %449 : vector<1x64xf32>
      %cst_124 = arith.constant dense<0.000000e+00> : vector<2x64xf32>
      %451 = tpu.matmul %426, %427, %cst_124 {dimension_numbers = #tpu.dot_dimension_numbers<[1], [0], [0], [1], [0, 0, 1, 1], [], []>} : vector<2x32xf32>, vector<32x64xf32>, vector<2x64xf32> -> vector<2x64xf32>
      %452 = vector.broadcast %433 : vector<2x1xf32> to vector<2x64xf32>
      %453 = vector.broadcast %450 : vector<1x64xf32> to vector<2x64xf32>
      %454 = arith.mulf %452, %453 : vector<2x64xf32>
      %455 = arith.divf %451, %454 : vector<2x64xf32>
      %cst_125 = arith.constant 5.000000e-02 : f32
      %456 = vector.broadcast %cst_125 : f32 to vector<2x1xf32>
      %457 = arith.divf %444, %456 : vector<2x1xf32>
      %cst_126 = arith.constant 5.000000e-02 : f32
      %458 = vector.broadcast %cst_126 : f32 to vector<2x64xf32>
      %459 = arith.divf %455, %458 : vector<2x64xf32>
      %cst_127 = arith.constant dense<0xFF800000> : vector<2xf32>
      %460 = vector.multi_reduction <maximumf>, %459, %cst_127 [1] : vector<2x64xf32> to vector<2xf32>
      %461 = vector.shape_cast %460 : vector<2xf32> to vector<2x1xf32>
      %462 = arith.maximumf %461, %457 : vector<2x1xf32>
      %463 = arith.subf %457, %462 : vector<2x1xf32>
      %464 = math.exp %463 : vector<2x1xf32>
      %465 = vector.broadcast %462 : vector<2x1xf32> to vector<2x64xf32>
      %466 = arith.subf %459, %465 : vector<2x64xf32>
      %467 = math.exp %466 : vector<2x64xf32>
      %cst_128 = arith.constant dense<0.000000e+00> : vector<2xf32>
      %468 = vector.multi_reduction <add>, %467, %cst_128 [1] : vector<2x64xf32> to vector<2xf32>
      %469 = vector.shape_cast %468 : vector<2xf32> to vector<2x1xf32>
      %470 = arith.addf %464, %469 : vector<2x1xf32>
      %471 = math.log %470 : vector<2x1xf32>
      %472 = arith.addf %471, %462 : vector<2x1xf32>
      %473 = arith.subf %457, %472 : vector<2x1xf32>
      %cst_129 = arith.constant 0.000000e+00 : f32
      %474 = vector.broadcast %cst_129 : f32 to vector<2x1xf32>
      %475 = arith.subf %474, %473 : vector<2x1xf32>
      %476 = arith.subf %457, %472 : vector<2x1xf32>
      %477 = vector.broadcast %472 : vector<2x1xf32> to vector<2x64xf32>
      %478 = arith.subf %459, %477 : vector<2x64xf32>
      %cst_130 = arith.constant dense<0.000000e+00> : vector<2xf32>
      %479 = vector.multi_reduction <add>, %478, %cst_130 [1] : vector<2x64xf32> to vector<2xf32>
      %480 = vector.shape_cast %479 : vector<2xf32> to vector<2x1xf32>
      %481 = arith.addf %476, %480 : vector<2x1xf32>
      %cst_131 = arith.constant 0.000000e+00 : f32
      %482 = vector.broadcast %cst_131 : f32 to vector<2x1xf32>
      %483 = arith.subf %482, %481 : vector<2x1xf32>
      %cst_132 = arith.constant 6.500000e+01 : f32
      %484 = vector.broadcast %cst_132 : f32 to vector<2x1xf32>
      %485 = arith.divf %483, %484 : vector<2x1xf32>
      %cst_133 = arith.constant 0.949999988 : f32
      %486 = vector.broadcast %cst_133 : f32 to vector<2x1xf32>
      %487 = arith.mulf %486, %475 : vector<2x1xf32>
      %cst_134 = arith.constant 5.000000e-02 : f32
      %488 = vector.broadcast %cst_134 : f32 to vector<2x1xf32>
      %489 = arith.mulf %488, %485 : vector<2x1xf32>
      %490 = arith.addf %487, %489 : vector<2x1xf32>
      %491 = vector.shape_cast %490 : vector<2x1xf32> to vector<1x2x1xf32>
      %cst_135 = arith.constant dense<0.000000e+00> : vector<1xf32>
      %492 = vector.multi_reduction <add>, %491, %cst_135 [1, 2] : vector<1x2x1xf32> to vector<1xf32>
      %493 = vector.shape_cast %492 : vector<1xf32> to vector<1x1x1xf32>
      %494 = vector.extract %493[0, 0, 0] : f32 from vector<1x1x1xf32>
      %cst_136 = arith.constant 2.000000e+00 : f32
      %495 = arith.divf %494, %cst_136 : f32
      %496 = vector.broadcast %495 : f32 to vector<1x1xf32>
      %c0_137 = arith.constant 0 : index
      %c0_138 = arith.constant 0 : index
      %497 = vector.load %arg7[%c0_137, %c0_138] : memref<1x1xf32, #tpu.memory_space<vmem>>, vector<1x1xf32>
      tpu.vector_store %arg7[%c0_137, %c0_138], %496 {strides = array<i32>} : memref<1x1xf32, #tpu.memory_space<vmem>>, vector<1x1xf32>,
    } else {
    }
    return
  }
  func.func @transform_0(%arg0: i32) -> (i32, i32, i32) {
    %c0_i32 = arith.constant 0 : i32
    %c0_i32_0 = arith.constant 0 : i32
    %c0_i32_1 = arith.constant 0 : i32
    return %arg0, %c0_i32, %c0_i32_0 : i32, i32, i32
  }
  func.func @transform_1(%arg0: i32) -> (i32, i32, i32) {
    %c0_i32 = arith.constant 0 : i32
    %c0_i32_0 = arith.constant 0 : i32
    %c0_i32_1 = arith.constant 0 : i32
    return %arg0, %c0_i32, %c0_i32_0 : i32, i32, i32
  }
  func.func @transform_2(%arg0: i32) -> (i32, i32, i32) {
    %c0_i32 = arith.constant 0 : i32
    %c0_i32_0 = arith.constant 0 : i32
    %c0_i32_1 = arith.constant 0 : i32
    return %arg0, %c0_i32, %c0_i32_0 : i32, i32, i32
  }
  func.func @transform_3(%arg0: i32) -> (i32, i32, i32) {
    %c0_i32 = arith.constant 0 : i32
    %c0_i32_0 = arith.constant 0 : i32
    %c0_i32_1 = arith.constant 0 : i32
    return %arg0, %c0_i32, %c0_i32_0 : i32, i32, i32
  }
  func.func @transform_4(%arg0: i32) -> (i32, i32) {
    %c0_i32 = arith.constant 0 : i32
    %c0_i32_0 = arith.constant 0 : i32
    %c0_i32_1 = arith.constant 0 : i32
    return %c0_i32, %c0_i32_0 : i32, i32
  }
  func.func @transform_5(%arg0: i32) -> (i32, i32, i32) {
    %c0_i32 = arith.constant 0 : i32
    %c0_i32_0 = arith.constant 0 : i32
    %c0_i32_1 = arith.constant 0 : i32
    return %arg0, %c0_i32, %c0_i32_0 : i32, i32, i32
  }
  func.func @transform_6(%arg0: i32) -> (i32, i32) {
    %c0_i32 = arith.constant 0 : i32
    %c0_i32_0 = arith.constant 0 : i32
    %c0_i32_1 = arith.constant 0 : i32
    return %c0_i32, %c0_i32_0 : i32, i32
  }
}

</mosaic_0001>

<bundles_post_ra>
// kernel: moco_forward.1
= control target key start
LH: loop header
LB: loop body
LE: loop exit
PB: predicated region body
PF: predicated region fallthrough
CT: control target
= control target key end

     0   :  { %12 = vsyncpa [#allocation4], 0  ;;  %s2933_s21 = smov 0   ;;  %s3368_s0 = inlined_call_operand.vmem [shape: f32[2,16,32], index: 0, kind: input, shape index: {}]   ;;  %s3369_s1 = inlined_call_operand.vmem [shape: f32[2,2,8], index: 1, kind: input, shape index: {}]   ;;  %s3370_s2 = inlined_call_operand.vmem [shape: bf16[2,352,96], index: 2, kind: input, shape index: {}]   ;;  %s3371_s3 = inlined_call_operand.vmem [shape: f32[2,19,96], index: 3, kind: input, shape index: {}]   ;;  %s3372_s4 = inlined_call_operand.vmem [shape: f32[32,64], index: 4, kind: input, shape index: {}]   ;;  %s3373_s5 = inlined_call_operand.vmem [shape: f32[2,2,32], index: 5, kind: output, shape index: {0}]   ;;  %s3374_s6 = inlined_call_operand.hbm [shape: f32[1,1], index: 6, kind: output, shape index: {1}]  }
   0x1 LB: > { %s2939_s22 = sadd.s32 4294967295, %s2876_s21   ;;  %p2438_p0 = scmp.ge.s32.totalorder %s2876_s21, 1  ;;  %s2876_s21 = sphi %s2933_s21, %s18_s21  }
   0x2   : > { %p240_p1 = scmp.lt.s32.totalorder %s2876_s21, 3 }
   0x4   : > { %p241_p2 = pnand %p2438_p0, %p240_p1 }
   0x5   : > { %p283_p3 = scmp.lt.s32.totalorder (!%p241_p2), %s2939_s22, 1  ;;  %s2879_s12 = smov (!%p241_p2), 96  }
   0x6   : > { %244 = sbr.rel (%p241_p2) target bundleno = 5052 (0x13bc), region = 40  ;;  %s2880_s13 = smov (!%p241_p2), 120  }
   0x7   : > { %s2881_s14 = smov (!%p241_p2), 88   ;;  %s2882_s15 = smov (!%p241_p2), 104  }
   0x8   : > { %s2883_s16 = smov (!%p241_p2), 112   ;;  %s2884_s17 = smov (!%p241_p2), 72  }
   0x9   : > { %s2885_s18 = smov (!%p241_p2), 80   ;;  %s2886_s26 = smov (!%p241_p2), 64  }
   0xa   : > { %s2889_s29 = smov (!%p241_p2), 40   ;;  %s2890_s30 = smov (!%p241_p2), 8  }
   0xb   : > { %s2945_s23 = scalar_select %p283_p3, %s2939_s22, 1  ;;  %vm315_vm0 = vcmask 261120   ;;  %v2878_v4 = vmov 32.0   ;;  %vm411_vm8 = vcmask 64512   ;;  %vm973_vm9 = vcmask 130048  }
   0xc   : > { %2720 = vrcp.f32 %v2878_v4  ;;  %s2892_s9 = smov 24   ;;  %vm976_vm10 = vcmask 195584   ;;  %p2590_p4 = scmp.ne.s32.totalorder %s2939_s22, 0 }
   0xd   : > { %s2597_s24 = sshll.u32 %s2945_s23, 4  ;;  %s2620_s28 = smul.u32 176, %s2945_s23 }
   0xe   : > { %s287_s27 = scalar_lea.vmem %s3368_s0, %s2597_s24  ;;  %s2621_s8 = smul.u32 24, %s2945_s23 }
   0xf   : > { %v307_v0 = vld [vmem:[%s287_s27] sm:$0xff]  ;;  %v308_v2 = vld [vmem:[%s287_s27 + $0x8] sm:$0xff]  ;;  %s2963_s7 = scalar_lea.vmem %s3370_s2, %s2620_s28  ;;  %s2441_s19 = sshll.u32 %s2945_s23, 1 }
  0x10   : > { %v316_v1 = vsel %vm315_vm0, %v307_v0, 0.0  ;;  %v319_v3 = vsel %vm315_vm0, %v308_v2, 0.0  ;;  %v2599_v21 = vld [vmem:[%s2963_s7 + $0x8] sm:$0xff]  ;;  %v2598_v23 = vld [vmem:[%s2963_s7] sm:$0xff]  ;;  %s2973_s11 = scalar_lea.vmem %s3371_s3, %s2621_s8  ;;  %s291_s25 = scalar_lea.vmem %s3369_s1, %s2441_s19 }
  0x11   : > { %317 = vadd.xlane.f32.xlu0 %v316_v1  ;;  %400 = vmatpush.bf16.msra.mxu0 %v2599_v21  ;;  %v2976_v38 = vld [vmem:[%s2973_s11] sm:$0xff]  ;;  %s2887_s27 = smov 56   ;;  %s2888_s28 = smov 48  }
  0x12   : > { %v2721_v5 = vpop.eup %2720  ;;  %v367_v43 = vperm.slane %v2976_v38, 0  ;;  %v370_v48 = vperm.slane %v2976_v38, 1  ;;  %v378_v53 = vperm.slane %v2976_v38, 2  ;;  %s2891_s8 = smov 16  }
  0x13   : > { %v323_v6 = vmul.f32 32.0, %v2721_v5  ;;  %vm327_vm1 = vweird.f32 %v2721_v5 }
  0x15   : > { %v324_v7 = vsub.f32 1.0, %v323_v6  ;;  %401 = vmatpush.bf16.msra.mxu0 %v2598_v23 }
  0x17   : > { %v325_v8 = vmul.f32 %v2721_v5, %v324_v7 }
  0x19   : > { %320 = vadd.xlane.f32.xlu0 %v319_v3  ;;  %v326_v9 = vadd.f32 %v2721_v5, %v325_v8  ;;  %v312_v8 = vld [vmem:[%s291_s25] sm:$0x3] }
  0x1b   : > { %v2953_v10 = vsel %vm327_vm1, %v2721_v5, %v326_v9  ;;  %v3044_v9 = vperm.slane %v312_v8, 0 }
  0x84   : > { %v318_v11 = vpop.xlane.xlu0 %317 }
  0x85   : > { %v329_v12 = vmul.f32 %v2953_v10, %v318_v11 }
  0x87   : > { %v331_v13 = vsub.f32 %v307_v0, %v329_v12 }
  0x89   : > { %v333_v14 = vmul.f32 %v331_v13, %v331_v13 }
  0x8b   : > { %v335_v15 = vsel %vm315_vm0, %v333_v14, 0.0 }
  0x8c   : > { %336 = vadd.xlane.f32.xlu1 %v335_v15  ;;  %v321_v16 = vpop.xlane.xlu0 %320  ;;  %v314_v15 = vrot.slane %v312_v8, 1 }
  0x8d   : > { %v330_v17 = vmul.f32 %v2953_v10, %v321_v16 }
  0x8e   : > { %v3048_v16 = vperm.slane %v314_v15, 0 }
  0x8f   : > { %v332_v18 = vsub.f32 %v308_v2, %v330_v17 }
  0x91   : > { %v334_v19 = vmul.f32 %v332_v18, %v332_v18 }
  0x93   : > { %v338_v20 = vsel %vm315_vm0, %v334_v19, 0.0 }
  0x94   : > { %339 = vadd.xlane.f32.xlu1 %v338_v20 }
  0xff   : > { %v337_v22 = vpop.xlane.xlu1 %336 }
 0x100   : > { %v341_v24 = vmul.f32 %v337_v22, %v2953_v10 }
 0x102   : > { %v343_v25 = vadd.f32 1e-05, %v341_v24 }
 0x104   : > { %2722 = vrsqrt.f32 %v343_v25  ;;  %vm351_vm3 = vweird.f32 %v343_v25 }
 0x107   : > { %v340_v26 = vpop.xlane.xlu1 %339 }
 0x108   : > { %v342_v27 = vmul.f32 %v340_v26, %v2953_v10 }
 0x10a   : > { %v2723_v28 = vpop.eup %2722  ;;  %v344_v29 = vadd.f32 1e-05, %v342_v27 }
 0x10b   : > { %v346_v30 = vmul.f32 %v2723_v28, %v343_v25  ;;  %vm352_vm2 = vweird.f32 %v2723_v28 }
 0x10c   : > { %2724 = vrsqrt.f32 %v344_v29  ;;  %vm353_vm4 = vmor %vm351_vm3, %vm352_vm2  ;;  %vm361_vm6 = vweird.f32 %v344_v29  ;;  %vm1153_vm2 = vcmask 523264  }
 0x10d   : > { %v347_v31 = vmul.f32 %v2723_v28, %v346_v30 }
 0x10f   : > { %v348_v32 = vmul.f32 0.5, %v347_v31 }
 0x111   : > { %v349_v33 = vsub.f32 1.5, %v348_v32 }
 0x112   : > { %v2725_v34 = vpop.eup %2724 }
 0x113   : > { %v350_v35 = vmul.f32 %v2723_v28, %v349_v33  ;;  %v356_v36 = vmul.f32 %v2725_v34, %v344_v29  ;;  %vm362_vm5 = vweird.f32 %v2725_v34 }
 0x114   : > { %vm363_vm7 = vmor %vm361_vm6, %vm362_vm5 }
 0x115   : > { %v357_v37 = vmul.f32 %v2725_v34, %v356_v36  ;;  %v354_v39 = vsel %vm353_vm4, %v2723_v28, %v350_v35 }
 0x116   : > { %v365_v42 = vmul.f32 %v354_v39, %v331_v13 }
 0x117   : > { %v358_v40 = vmul.f32 0.5, %v357_v37 }
 0x118   : > { %v368_v47 = vmul.f32 %v367_v43, %v365_v42 }
 0x119   : > { %v359_v41 = vsub.f32 1.5, %v358_v40 }
 0x11a   : > { %v2980_v50 = vadd.f32 %v370_v48, %v368_v47 }
 0x11b   : > { %v360_v44 = vmul.f32 %v2725_v34, %v359_v41 }
 0x11d   : > { %v364_v45 = vsel %vm363_vm7, %v2725_v34, %v360_v44 }
 0x11e   : > { %v366_v46 = vmul.f32 %v364_v45, %v332_v18 }
 0x120   : > { %v369_v49 = vmul.f32 %v367_v43, %v366_v46 }
 0x122   : > { %v2982_v51 = vadd.f32 %v370_v48, %v369_v49 }
 0x124   : > { %v377_v52 = vpack.c.bf16 %v2982_v51, %v2980_v50 }
 0x126   : > { %2453 = vmatmul.msk.bf16.vlgmr.msra.gmra.mxu0 %vm315_vm0, %v377_v52 }
 0x1a3   : > { %v403_v54 = vpop.f32.mrf.mxu0 }
 0x1a4   : > { %v2988_v55 = vadd.f32 %v403_v54, %v378_v53 }
 0x1a6   : > { %409 = vrot.lane.b32.xlu2 %v2988_v55, %s2879_s12 }
 0x1ab   : > { %v405_v56 = vpop.f32.mrf.mxu0 }
 0x1ac   : > { %v2992_v57 = vadd.f32 %v405_v56, %v378_v53 }
 0x1ae   : > { %573 = vrot.lane.b32.xlu1 %v2992_v57, %s2880_s13  ;;  %575 = vrot.lane.b32.xlu0 %v2992_v57, %s2881_s14  ;;  %v2660_v46 = vpack.i.bf16 %v2992_v57, %v2988_v55 }
 0x1af   : > { %437 = vrot.lane.b32.xlu2 %v2992_v57, %s2879_s12 }
 0x1b6   : > { %813 = vrot.lane.b32.xlu1 %v2988_v55, %s2882_s15  ;;  %679 = vrot.lane.b32.xlu0 %v2988_v55, %s2883_s16 }
 0x1b7   : > { %547 = vrot.lane.b32.xlu2 %v2988_v55, %s2881_s14 }
 0x1be   : > { %843 = vrot.lane.b32.xlu1 %v2992_v57, %s2884_s17  ;;  %709 = vrot.lane.b32.xlu0 %v2992_v57, %s2885_s18 }
 0x1bf   : > { %681 = vrot.lane.b32.xlu2 %v2988_v55, %s2885_s18 }
 0x1c6   : > { %841 = vrot.lane.b32.xlu0 %v2992_v57, %s2882_s15 }
 0x1c7   : > { %545 = vrot.lane.b32.xlu2 %v2988_v55, %s2880_s13 }
 0x1cf   : > { %815 = vrot.lane.b32.xlu2 %v2988_v55, %s2884_s17 }
 0x1d7   : > { %707 = vrot.lane.b32.xlu2 %v2992_v57, %s2883_s16 }
 0x200   : > { %v410_v58 = vpop.permute.xlu2 %409 }
 0x201   : > { %2454 = vmatpush.xpose.msk.msrb.mxu0 %vm411_vm8, %v410_v58 }
 0x204   : > { %2455 = vmatmul.msk.f32.vlgmr.msrb.gmra.mxu0 %vm411_vm8, %v2988_v55 }
 0x209   : > { %v438_v59 = vpop.permute.xlu2 %437 }
 0x20a   : > { %2456 = vmatpush.xpose.msk.msra.mxu2 %vm411_vm8, %v438_v59 }
 0x20d   : > { %2457 = vmatmul.msk.f32.vlgmr.msra.gmra.mxu2 %vm411_vm8, %v2992_v57 }
 0x211   : > { %v548_v60 = vpop.permute.xlu2 %547 }
 0x212   : > { %2460 = vmatpush.xpose.msk.msra.mxu1 %vm411_vm8, %v548_v60 }
 0x219   : > { %v682_v61 = vpop.permute.xlu2 %681 }
 0x220   : > { %v574_v62 = vpop.permute.xlu1 %573  ;;  %v576_v63 = vpop.permute.xlu0 %575 }
 0x221   : > { %v546_v0 = vpop.permute.xlu2 %545  ;;  %2462 = vmatpush.xpose.msk.msrb.mxu2 %vm411_vm8, %v576_v63 }
 0x222   : > { %2461 = vmatmul.msk.f32.vlgmr.msra.gmra.mxu1 %vm411_vm8, %v546_v0 }
 0x224   : > { %2463 = vmatmul.msk.f32.vlgmr.msrb.gmra.mxu2 %vm411_vm8, %v574_v62 }
 0x225   : > { %2466 = vmatpush.xpose.msk.msra.mxu2 %vm411_vm8, %v682_v61 }
 0x228   : > { %v814_v1 = vpop.permute.xlu1 %813  ;;  %v680_v2 = vpop.permute.xlu0 %679 }
 0x229   : > { %v816_v3 = vpop.permute.xlu2 %815 }
 0x22a   : > { %2472 = vmatpush.xpose.msk.msrb.mxu2 %vm411_vm8, %v816_v3 }
 0x22c   : > { %2467 = vmatmul.msk.f32.vlgmr.msra.gmra.mxu2 %vm411_vm8, %v680_v2 }
 0x230   : > { %v844_v4 = vpop.permute.xlu1 %843  ;;  %v710_v5 = vpop.permute.xlu0 %709 }
 0x231   : > { %2468 = vmatpush.xpose.msk.msra.mxu0 %vm411_vm8, %v710_v5  ;;  %v708_v6 = vpop.permute.xlu2 %707 }
 0x234   : > { %2469 = vmatmul.msk.f32.vlgmr.msra.gmra.mxu0 %vm411_vm8, %v708_v6  ;;  %2473 = vmatmul.msk.f32.vlgmr.msrb.gmra.mxu2 %vm411_vm8, %v814_v1 }
 0x235   : > { %2474 = vmatpush.xpose.msk.msrb.mxu0 %vm411_vm8, %v844_v4 }
 0x238   : > { %v842_v7 = vpop.permute.xlu0 %841 }
 0x23c   : > { %2475 = vmatmul.msk.f32.vlgmr.msrb.gmra.mxu0 %vm411_vm8, %v842_v7 }
 0x281   : > { %v433_v11 = vpop.f32.mrf.mxu0 }
 0x282   : > { %v463_v12 = vmul.f32 0.35355338, %v433_v11 }
 0x284   : > { %v469_v13 = vadd.f32 %v3044_v9, %v463_v12 }
 0x286   : > { %v471_v14 = vsel %vm411_vm8, %v469_v13, -inf }
 0x287   : > { %472 = vmax.xlane.f32.xlu2 %v471_v14 }
 0x290   : > { %v460_v17 = vpop.f32.mrf.mxu2 }
 0x291   : > { %v464_v18 = vmul.f32 0.35355338, %v460_v17 }
 0x293   : > { %v470_v19 = vadd.f32 %v3048_v16, %v464_v18 }
 0x295   : > { %v474_v20 = vsel %vm411_vm8, %v470_v19, -inf }
 0x296   : > { %475 = vmax.xlane.f32.xlu1 %v474_v20 }
 0x29f   : > { %v570_v21 = vpop.f32.mrf.mxu1 }
 0x2a0   : > { %v601_v22 = vmul.f32 0.35355338, %v570_v21 }
 0x2a2   : > { %v603_v23 = vadd.f32 %v601_v22, %v3044_v9 }
 0x2a4   : > { %v605_v24 = vsel %vm411_vm8, %v603_v23, -inf }
 0x2a5   : > { %606 = vmax.xlane.f32.xlu0 %v605_v24 }
 0x2a7   : > { %v598_v25 = vpop.f32.mrf.mxu2 }
 0x2a8   : > { %v602_v26 = vmul.f32 0.35355338, %v598_v25 }
 0x2aa   : > { %v604_v27 = vadd.f32 %v602_v26, %v3048_v16 }
 0x2ac   : > { %v608_v28 = vsel %vm411_vm8, %v604_v27, -inf }
 0x2ad   : > { %609 = vmax.xlane.f32.xlu2 %v608_v28 }
 0x2af   : > { %v704_v29 = vpop.f32.mrf.mxu2 }
 0x2b0   : > { %v735_v42 = vmul.f32 0.35355338, %v704_v29 }
 0x2b1   : > { %v732_v30 = vpop.f32.mrf.mxu0 }
 0x2b2   : > { %v736_v31 = vmul.f32 0.35355338, %v732_v30  ;;  %v737_v44 = vadd.f32 %v735_v42, %v3044_v9 }
 0x2b4   : > { %v738_v32 = vadd.f32 %v736_v31, %v3048_v16  ;;  %v739_v45 = vsel %vm411_vm8, %v737_v44, -inf }
 0x2b6   : > { %v742_v33 = vsel %vm411_vm8, %v738_v32, -inf }
 0x2b7   : > { %v838_v34 = vpop.f32.mrf.mxu2  ;;  %743 = vmax.xlane.f32.xlu0 %v742_v33 }
 0x2b8   : > { %v869_v35 = vmul.f32 0.35355338, %v838_v34 }
 0x2b9   : > { %v866_v36 = vpop.f32.mrf.mxu0 }
 0x2ba   : > { %v870_v37 = vmul.f32 0.35355338, %v866_v36  ;;  %v871_v39 = vadd.f32 %v869_v35, %v3044_v9 }
 0x2bc   : > { %v873_v40 = vsel %vm411_vm8, %v871_v39, -inf  ;;  %v3061_v41 = vadd.f32 %v870_v37, %v3048_v16 }
 0x2bd   : > { %874 = vmax.xlane.f32.xlu2 %v873_v40 }
 0x2be   : > { %v876_v43 = vsel %vm411_vm8, %v3061_v41, -inf }
 0x2bf   : > { %877 = vmax.xlane.f32.xlu1 %v876_v43 }
 0x2c7   : > { %740 = vmax.xlane.f32.xlu1 %v739_v45 }
 0x2e0   : > { %2661 = vrot.lane.b32.xlu1 %v2660_v46, %s2886_s26 }
 0x2fa   : > { %v473_v47 = vpop.xlane.xlu2 %472 }
 0x2fb   : > { %v477_v48 = vsub.f32 %v469_v13, %v473_v47 }
 0x2fd   : > { %v479_v49 = vmul.f32 1.442695, %v477_v48 }
 0x2ff   : > { %2726 = vpow2.f32 %v479_v49 }
 0x305   : > { %v3070_v52 = vpop.eup %2726 }
 0x306   : > { %v483_v53 = vsel %vm411_vm8, %v3070_v52, 0.0 }
 0x307   : > { %484 = vadd.xlane.f32.xlu0 %v483_v53 }
 0x309   : > { %v476_v54 = vpop.xlane.xlu1 %475 }
 0x30a   : > { %v478_v56 = vsub.f32 %v470_v19, %v476_v54 }
 0x30c   : > { %v481_v58 = vmul.f32 1.442695, %v478_v56 }
 0x30e   : > { %2728 = vpow2.f32 %v481_v58 }
 0x314   : > { %v3074_v59 = vpop.eup %2728 }
 0x315   : > { %v486_v60 = vsel %vm411_vm8, %v3074_v59, 0.0 }
 0x316   : > { %487 = vadd.xlane.f32.xlu2 %v486_v60 }
 0x318   : > { %v607_v61 = vpop.xlane.xlu0 %606 }
 0x319   : > { %v611_v62 = vsub.f32 %v603_v23, %v607_v61 }
 0x31b   : > { %v613_v63 = vmul.f32 1.442695, %v611_v62 }
 0x31d   : > { %2730 = vpow2.f32 %v613_v63 }
 0x320   : > { %v610_v0 = vpop.xlane.xlu2 %609 }
 0x321   : > { %v612_v1 = vsub.f32 %v604_v27, %v610_v0 }
 0x323   : > { %v3078_v2 = vpop.eup %2730  ;;  %v615_v3 = vmul.f32 1.442695, %v612_v1 }
 0x324   : > { %v617_v4 = vsel %vm411_vm8, %v3078_v2, 0.0 }
 0x325   : > { %2732 = vpow2.f32 %v615_v3  ;;  %618 = vadd.xlane.f32.xlu0 %v617_v4 }
 0x32a   : > { %v744_v5 = vpop.xlane.xlu0 %743 }
 0x32b   : > { %v2733_v6 = vpop.eup %2732  ;;  %v746_v7 = vsub.f32 %v738_v32, %v744_v5 }
 0x32c   : > { %v620_v8 = vsel %vm411_vm8, %v2733_v6, 0.0 }
 0x32d   : > { %v749_v11 = vmul.f32 1.442695, %v746_v7  ;;  %621 = vadd.xlane.f32.xlu2 %v620_v8 }
 0x32f   : > { %2734 = vpow2.f32 %v749_v11 }
 0x330   : > { %v875_v12 = vpop.xlane.xlu2 %874 }
 0x331   : > { %v879_v13 = vsub.f32 %v871_v39, %v875_v12 }
 0x332   : > { %v878_v14 = vpop.xlane.xlu1 %877 }
 0x333   : > { %v881_v15 = vmul.f32 1.442695, %v879_v13  ;;  %v880_v29 = vsub.f32 %v3061_v41, %v878_v14 }
 0x335   : > { %v3083_v17 = vpop.eup %2734  ;;  %2736 = vpow2.f32 %v881_v15  ;;  %v883_v30 = vmul.f32 1.442695, %v880_v29 }
 0x336   : > { %v754_v18 = vsel %vm411_vm8, %v3083_v17, 0.0 }
 0x337   : > { %755 = vadd.xlane.f32.xlu0 %v754_v18  ;;  %v2601_v18 = vld [vmem:[%s2963_s7 + $0x18] sm:$0xff] }
 0x338   : > { %1006 = vmatpush.bf16.msra.mxu2 %v2601_v18 }
 0x33a   : > { %v741_v19 = vpop.xlane.xlu1 %740 }
 0x33b   : > { %v3087_v20 = vpop.eup %2736  ;;  %v745_v21 = vsub.f32 %v737_v44, %v741_v19  ;;  %v2600_v19 = vld [vmem:[%s2963_s7 + $0x10] sm:$0xff] }
 0x33c   : > { %v885_v22 = vsel %vm411_vm8, %v3087_v20, 0.0  ;;  %1007 = vmatpush.bf16.msra.mxu2 %v2600_v19  ;;  %v1063_v19 = vperm.slane %v2976_v38, 5 }
 0x33d   : > { %v747_v23 = vmul.f32 1.442695, %v745_v21  ;;  %886 = vadd.xlane.f32.xlu1 %v885_v22 }
 0x33f   : > { %2738 = vpow2.f32 %v747_v23 }
 0x340   : > { %2740 = vpow2.f32 %v883_v30 }
 0x345   : > { %v2739_v24 = vpop.eup %2738  ;;  %2666 = vrot.lane.b32.xlu2 %v2660_v46, %s2887_s27 }
 0x346   : > { %v751_v25 = vsel %vm411_vm8, %v2739_v24, 0.0  ;;  %v2741_v31 = vpop.eup %2740 }
 0x347   : > { %752 = vadd.xlane.f32.xlu0 %v751_v25  ;;  %v888_v32 = vsel %vm411_vm8, %v2741_v31, 0.0 }
 0x352   : > { %v2662_v26 = vpop.permute.xlu1 %2661 }
 0x353   : > { %v2663_v27 = vunpack.i.l.bf16 %v2662_v26  ;;  %v2664_v28 = vunpack.i.h.bf16 %v2662_v26 }
 0x355   : > { %514 = vmatpush.msra.mxu3 %v2663_v27 }
 0x357   : > { %540 = vmatpush.msrb.mxu3 %v2664_v28 }
 0x35b   : > { %2671 = vrot.lane.b32.xlu0 %v2660_v46, %s2888_s28 }
 0x363   : > { %895 = vrot.lane.b32.xlu0 %v2988_v55, %s2889_s29 }
 0x36b   : > { %921 = vrot.lane.b32.xlu0 %v2992_v57, %s2889_s29 }
 0x36e   : > { %889 = vadd.xlane.f32.xlu2 %v888_v32 }
 0x37a   : > { %v485_v33 = vpop.xlane.xlu0 %484 }
 0x37b   : > { %2742 = vrcp.f32 %v485_v33 }
 0x381   : > { %v2743_v34 = vpop.eup %2742 }
 0x382   : > { %v491_v35 = vmul.f32 %v2743_v34, %v3070_v52 }
 0x384   : > { %2458 = vmatmul.msk.f32.vlgmr.msra.gmra.mxu3 %vm411_vm8, %v491_v35 }
 0x389   : > { %v488_v36 = vpop.xlane.xlu2 %487 }
 0x38a   : > { %2744 = vrcp.f32 %v488_v36  ;;  %v984_v36 = vperm.slane %v2976_v38, 3 }
 0x390   : > { %v2745_v37 = vpop.eup %2744 }
 0x391   : > { %v492_v55 = vmul.f32 %v2745_v37, %v3074_v59 }
 0x393   : > { %2459 = vmatmul.msk.f32.vlgmr.msrb.gmra.mxu3 %vm411_vm8, %v492_v55 }
 0x398   : > { %v619_v39 = vpop.xlane.xlu0 %618 }
 0x399   : > { %2746 = vrcp.f32 %v619_v39 }
 0x39f   : > { %v2747_v40 = vpop.eup %2746 }
 0x3a0   : > { %v622_v57 = vpop.xlane.xlu2 %621  ;;  %v625_v45 = vmul.f32 %v2747_v40, %v3078_v2 }
 0x3a1   : > { %2748 = vrcp.f32 %v622_v57 }
 0x3a7   : > { %v2749_v41 = vpop.eup %2748 }
 0x3a8   : > { %v2667_v42 = vpop.permute.xlu2 %2666  ;;  %v626_v46 = vmul.f32 %v2749_v41, %v2733_v6 }
 0x3a9   : > { %v2668_v43 = vunpack.i.l.bf16 %v2667_v42  ;;  %v2669_v44 = vunpack.i.h.bf16 %v2667_v42 }
 0x3aa   : > { %v756_v47 = vpop.xlane.xlu0 %755 }
 0x3ab   : > { %648 = vmatpush.msra.mxu3 %v2668_v43  ;;  %674 = vmatpush.msrb.mxu1 %v2669_v44  ;;  %2750 = vrcp.f32 %v756_v47 }
 0x3ac   : > { %2464 = vmatmul.msk.f32.vlgmr.msra.gmra.mxu3 %vm411_vm8, %v625_v45  ;;  %2465 = vmatmul.msk.f32.vlgmr.msrb.gmra.mxu1 %vm411_vm8, %v626_v46 }
 0x3b0   : > { %v887_v52 = vpop.xlane.xlu1 %886 }
 0x3b1   : > { %v2751_v49 = vpop.eup %2750 }
 0x3b2   : > { %v760_v59 = vmul.f32 %v2751_v49, %v3083_v17 }
 0x3ba   : > { %v753_v48 = vpop.xlane.xlu0 %752 }
 0x3bb   : > { %2752 = vrcp.f32 %v753_v48 }
 0x3bc   : > { %2754 = vrcp.f32 %v887_v52 }
 0x3c1   : > { %v2753_v53 = vpop.eup %2752 }
 0x3c2   : > { %v759_v60 = vmul.f32 %v2753_v53, %v2739_v24  ;;  %v2755_v61 = vpop.eup %2754 }
 0x3c3   : > { %v893_v63 = vmul.f32 %v2755_v61, %v3087_v20 }
 0x3cd   : > { %v2672_v54 = vpop.permute.xlu0 %2671 }
 0x3ce   : > { %v2674_v56 = vunpack.i.h.bf16 %v2672_v54  ;;  %v2673_v58 = vunpack.i.l.bf16 %v2672_v54 }
 0x3d0   : > { %782 = vmatpush.msrb.mxu3 %v2673_v58  ;;  %808 = vmatpush.msra.mxu1 %v2674_v56 }
 0x3d1   : > { %2470 = vmatmul.msk.f32.vlgmr.msrb.gmra.mxu3 %vm411_vm8, %v759_v60  ;;  %2471 = vmatmul.msk.f32.vlgmr.msra.gmra.mxu1 %vm411_vm8, %v760_v59  ;;  %v2602_v60 = vld [vmem:[%s2963_s7 + $0x20] sm:$0xff] }
 0x3d5   : > { %v896_v62 = vpop.permute.xlu0 %895 }
 0x3d6   : > { %916 = vmatpush.msra.mxu3 %v896_v62 }
 0x3d9   : > { %2476 = vmatmul.msk.f32.vlgmr.msra.gmra.mxu3 %vm411_vm8, %v893_v63 }
 0x3dd   : > { %v922_v0 = vpop.permute.xlu0 %921 }
 0x3de   : > { %942 = vmatpush.msrb.mxu1 %v922_v0 }
 0x3e1   : > { %v890_v1 = vpop.xlane.xlu2 %889 }
 0x3e2   : > { %2756 = vrcp.f32 %v890_v1 }
 0x3e8   : > { %v2757_v2 = vpop.eup %2756 }
 0x3e9   : > { %v894_v3 = vmul.f32 %v2757_v2, %v2741_v31 }
 0x3eb   : > { %2477 = vmatmul.msk.f32.vlgmr.msrb.gmra.mxu1 %vm411_vm8, %v894_v3 }
 0x407   : > { %v516_v4 = vpop.f32.mrf.mxu3 }
 0x416   : > { %v542_v5 = vpop.f32.mrf.mxu3 }
 0x429   : > { %v676_v6 = vpop.f32.mrf.mxu1 }
 0x42f   : > { %v650_v7 = vpop.f32.mrf.mxu3 }
 0x430   : > { %v2675_v8 = vpack.i.bf16 %v676_v6, %v650_v7 }
 0x432   : > { %2676 = vrot.lane.b32.xlu0 %v2675_v8, %s2890_s30 }
 0x44e   : > { %v810_v11 = vpop.f32.mrf.mxu1 }
 0x454   : > { %v784_v12 = vpop.f32.mrf.mxu3 }
 0x455   : > { %v2680_v13 = vpack.i.bf16 %v810_v11, %v784_v12 }
 0x457   : > { %2681 = vrot.lane.b32.xlu1 %v2680_v13, %s2891_s8 }
 0x45c   : > { %v918_v14 = vpop.f32.mrf.mxu3 }
 0x468   : > { %v944_v15 = vpop.f32.mrf.mxu1 }
 0x469   : > { %v2685_v17 = vpack.i.bf16 %v944_v15, %v918_v14  ;;  %v1060_v14 = vperm.slane %v2976_v38, 4 }
 0x46b   : > { %2686 = vrot.lane.b32.xlu0 %v2685_v17, %s2892_s9 }
 0x4a4   : > { %v2677_v20 = vpop.permute.xlu0 %2676 }
 0x4a5   : > { %v2679_v22 = vunpack.i.h.bf16 %v2677_v20  ;;  %v2678_v23 = vunpack.i.l.bf16 %v2677_v20 }
 0x4a7   : > { %v972_v27 = vsel %vm411_vm8, %v542_v5, %v2679_v22  ;;  %v971_v28 = vsel %vm411_vm8, %v516_v4, %v2678_v23 }
 0x4c9   : > { %v2682_v21 = vpop.permute.xlu1 %2681 }
 0x4ca   : > { %v2684_v24 = vunpack.i.h.bf16 %v2682_v21  ;;  %v2683_v25 = vunpack.i.l.bf16 %v2682_v21 }
 0x4cc   : > { %v975_v31 = vsel %vm973_vm9, %v972_v27, %v2684_v24  ;;  %v974_v32 = vsel %vm973_vm9, %v971_v28, %v2683_v25  ;;  %v2606_v27 = vld [vmem:[%s2963_s7 + $0x40] sm:$0xff]  ;;  %v2605_v28 = vld [vmem:[%s2963_s7 + $0x38] sm:$0xff] }
 0x4dd   : > { %v2687_v26 = vpop.permute.xlu0 %2686 }
 0x4de   : > { %v2689_v29 = vunpack.i.h.bf16 %v2687_v26  ;;  %v2688_v30 = vunpack.i.l.bf16 %v2687_v26  ;;  %v2607_v26 = vld [vmem:[%s2963_s7 + $0x48] sm:$0xff] }
 0x4df   : > { %1161 = vmatpush.bf16.msrb.mxu3 %v2607_v26 }
 0x4e0   : > { %v978_v33 = vsel %vm976_vm10, %v975_v31, %v2689_v29  ;;  %v977_v34 = vsel %vm976_vm10, %v974_v32, %v2688_v30  ;;  %v1071_v29 = vperm.slane %v2976_v38, 6  ;;  %v2604_v31 = vld [vmem:[%s2963_s7 + $0x30] sm:$0xff] }
 0x4e1   : > { %v983_v35 = vpack.c.bf16 %v978_v33, %v977_v34 }
 0x4e3   : > { %2486 = vmatmul.msk.bf16.vlgmr.msra.gmra.mxu2 %vm315_vm0, %v983_v35  ;;  %1162 = vmatpush.bf16.msrb.mxu3 %v2606_v27 }
 0x4e7   : > { %1163 = vmatpush.bf16.msrb.mxu3 %v2605_v28 }
 0x4eb   : > { %1164 = vmatpush.bf16.msrb.mxu3 %v2604_v31 }
 0x566   : > { %v1009_v37 = vpop.f32.mrf.mxu2 }
 0x567   : > { %v1010_v55 = vadd.f32 %v1009_v37, %v984_v36 }
 0x569   : > { %v1014_v39 = vadd.f32 %v1010_v55, %v2980_v50 }
 0x56b   : > { %v1016_v57 = vsel %vm315_vm0, %v1014_v39, 0.0 }
 0x56c   : > { %1017 = vadd.xlane.f32.xlu0 %v1016_v57 }
 0x56e   : > { %v1011_v40 = vpop.f32.mrf.mxu2 }
 0x56f   : > { %v1012_v41 = vadd.f32 %v1011_v40, %v984_v36 }
 0x571   : > { %v1015_v42 = vadd.f32 %v1012_v41, %v2982_v51  ;;  %v2603_v51 = vld [vmem:[%s2963_s7 + $0x28] sm:$0xff] }
 0x572   : > { %1093 = vmatpush.bf16.msra.mxu0 %v2603_v51 }
 0x573   : > { %v1019_v43 = vsel %vm315_vm0, %v1015_v42, 0.0 }
 0x574   : > { %1020 = vadd.xlane.f32.xlu2 %v1019_v43 }
 0x576   : > { %1094 = vmatpush.bf16.msra.mxu0 %v2602_v60 }
 0x5df   : > { %v1018_v44 = vpop.xlane.xlu0 %1017 }
 0x5e0   : > { %v1022_v45 = vmul.f32 %v1018_v44, %v2953_v10 }
 0x5e2   : > { %v1024_v46 = vsub.f32 %v1014_v39, %v1022_v45 }
 0x5e4   : > { %v1026_v47 = vmul.f32 %v1024_v46, %v1024_v46 }
 0x5e6   : > { %v1028_v48 = vsel %vm315_vm0, %v1026_v47, 0.0 }
 0x5e7   : > { %v1021_v50 = vpop.xlane.xlu2 %1020  ;;  %1029 = vadd.xlane.f32.xlu2 %v1028_v48 }
 0x5e8   : > { %v1023_v49 = vmul.f32 %v1021_v50, %v2953_v10 }
 0x5ea   : > { %v1025_v52 = vsub.f32 %v1015_v42, %v1023_v49 }
 0x5ec   : > { %v1027_v53 = vmul.f32 %v1025_v52, %v1025_v52 }
 0x5ee   : > { %v1031_v54 = vsel %vm315_vm0, %v1027_v53, 0.0 }
 0x5ef   : > { %1032 = vadd.xlane.f32.xlu1 %v1031_v54  ;;  %v1128_v54 = vperm.slane %v2976_v38, 7 }
 0x65a   : > { %v1030_v56 = vpop.xlane.xlu2 %1029 }
 0x65b   : > { %v1034_v58 = vmul.f32 %v1030_v56, %v2953_v10 }
 0x65d   : > { %v1036_v59 = vadd.f32 1e-05, %v1034_v58 }
 0x65f   : > { %2758 = vrsqrt.f32 %v1036_v59  ;;  %vm1044_vm12 = vweird.f32 %v1036_v59 }
 0x662   : > { %v1033_v61 = vpop.xlane.xlu1 %1032 }
 0x663   : > { %v1035_v62 = vmul.f32 %v1033_v61, %v2953_v10 }
 0x665   : > { %v2759_v63 = vpop.eup %2758  ;;  %v1037_v0 = vadd.f32 1e-05, %v1035_v62 }
 0x666   : > { %v1039_v1 = vmul.f32 %v2759_v63, %v1036_v59  ;;  %vm1045_vm11 = vweird.f32 %v2759_v63 }
 0x667   : > { %2760 = vrsqrt.f32 %v1037_v0  ;;  %vm1046_vm13 = vmor %vm1044_vm12, %vm1045_vm11  ;;  %vm1054_vm15 = vweird.f32 %v1037_v0 }
 0x668   : > { %v1040_v2 = vmul.f32 %v2759_v63, %v1039_v1 }
 0x66a   : > { %v1041_v3 = vmul.f32 0.5, %v1040_v2 }
 0x66c   : > { %v1042_v4 = vsub.f32 1.5, %v1041_v3 }
 0x66d   : > { %v2761_v5 = vpop.eup %2760 }
 0x66e   : > { %v1043_v6 = vmul.f32 %v2759_v63, %v1042_v4  ;;  %v1049_v7 = vmul.f32 %v2761_v5, %v1037_v0  ;;  %vm1055_vm14 = vweird.f32 %v2761_v5 }
 0x66f   : > { %vm1056_vm1 = vmor %vm1054_vm15, %vm1055_vm14 }
 0x670   : > { %v1050_v8 = vmul.f32 %v2761_v5, %v1049_v7  ;;  %v1047_v11 = vsel %vm1046_vm13, %v2759_v63, %v1043_v6 }
 0x671   : > { %v1058_v15 = vmul.f32 %v1047_v11, %v1024_v46  ;;  %v2609_v11 = vld [vmem:[%s2963_s7 + $0x58] sm:$0xff] }
 0x672   : > { %v1051_v12 = vmul.f32 0.5, %v1050_v8  ;;  %1250 = vmatpush.bf16.msra.mxu1 %v2609_v11 }
 0x673   : > { %v1061_v20 = vmul.f32 %v1060_v14, %v1058_v15  ;;  %v2608_v15 = vld [vmem:[%s2963_s7 + $0x50] sm:$0xff] }
 0x674   : > { %v1052_v13 = vsub.f32 1.5, %v1051_v12 }
 0x675   : > { %v1064_v23 = vadd.f32 %v1063_v19, %v1061_v20 }
 0x676   : > { %v1053_v17 = vmul.f32 %v2761_v5, %v1052_v13  ;;  %1251 = vmatpush.bf16.msra.mxu1 %v2608_v15 }
 0x678   : > { %v1057_v18 = vsel %vm1056_vm1, %v2761_v5, %v1053_v17 }
 0x679   : > { %v1059_v21 = vmul.f32 %v1057_v18, %v1025_v52 }
 0x67b   : > { %v1062_v22 = vmul.f32 %v1060_v14, %v1059_v21 }
 0x67d   : > { %v1065_v24 = vadd.f32 %v1063_v19, %v1062_v22 }
 0x67f   : > { %v1070_v25 = vpack.c.bf16 %v1065_v24, %v1064_v23 }
 0x681   : > { %2495 = vmatmul.msk.bf16.vlgmr.msra.gmra.mxu0 %vm315_vm0, %v1070_v25 }
 0x6fe   : > { %v1096_v30 = vpop.f32.mrf.mxu0 }
 0x6ff   : > { %v1097_v32 = vadd.f32 %v1096_v30, %v1071_v29 }
 0x701   : > { %v1101_v33 = vmul.f32 %v1097_v32, %v1097_v32 }
 0x703   : > { %v1103_v34 = vmul.f32 %v1101_v33, %v1097_v32 }
 0x705   : > { %v1105_v35 = vmul.f32 0.044715, %v1103_v34 }
 0x706   : > { %v1098_v36 = vpop.f32.mrf.mxu0 }
 0x707   : > { %v1107_v37 = vadd.f32 %v1105_v35, %v1097_v32  ;;  %v1099_v55 = vadd.f32 %v1098_v36, %v1071_v29  ;;  %v3159_v29 = vld [vmem:[%s2973_s11 + $0x8] sm:$0xff] }
 0x708   : > { %v1217_v33 = vperm.slane %v3159_v29, 0 }
 0x709   : > { %v1109_v39 = vmul.f32 0.7978846, %v1107_v37  ;;  %v1102_v57 = vmul.f32 %v1099_v55, %v1099_v55  ;;  %v1220_v37 = vperm.slane %v3159_v29, 1 }
 0x70b   : > { %v1104_v40 = vmul.f32 %v1102_v57, %v1099_v55  ;;  %2762 = vtanh.f32 %v1109_v39 }
 0x70d   : > { %v1106_v41 = vmul.f32 0.044715, %v1104_v40 }
 0x70f   : > { %v1108_v42 = vadd.f32 %v1106_v41, %v1099_v55 }
 0x711   : > { %v1110_v43 = vmul.f32 0.7978846, %v1108_v42  ;;  %v2763_v44 = vpop.eup %2762 }
 0x712   : > { %v1113_v45 = vadd.f32 1.0, %v2763_v44 }
 0x713   : > { %2764 = vtanh.f32 %v1110_v43  ;;  %v1228_v43 = vperm.slane %v3159_v29, 2 }
 0x714   : > { %v1115_v47 = vmul.f32 0.5, %v1113_v45 }
 0x716   : > { %v1117_v49 = vmul.f32 %v1115_v47, %v1097_v32 }
 0x719   : > { %v2765_v46 = vpop.eup %2764 }
 0x71a   : > { %v1114_v48 = vadd.f32 1.0, %v2765_v46 }
 0x71c   : > { %v1116_v50 = vmul.f32 0.5, %v1114_v48 }
 0x71e   : > { %v1118_v52 = vmul.f32 %v1116_v50, %v1099_v55 }
 0x720   : > { %v1127_v53 = vpack.c.bf16 %v1118_v52, %v1117_v49 }
 0x722   : > { %2512 = vmatmul.msk.bf16.vlgmr.msrb.gmra.mxu3 %vm1153_vm2, %v1127_v53 }
 0x7a5   : > { %v1166_v51 = vpop.f32.mrf.mxu3 }
 0x7a6   : > { %v1167_v56 = vadd.f32 %v1166_v51, %v1128_v54 }
 0x7a8   : > { %v1171_v58 = vadd.f32 %v1167_v56, %v1064_v23 }
 0x7aa   : > { %v1173_v59 = vsel %vm315_vm0, %v1171_v58, 0.0 }
 0x7ab   : > { %1174 = vadd.xlane.f32.xlu2 %v1173_v59 }
 0x7ad   : > { %v1168_v60 = vpop.f32.mrf.mxu3 }
 0x7ae   : > { %v1169_v61 = vadd.f32 %v1168_v60, %v1128_v54 }
 0x7b0   : > { %v1172_v62 = vadd.f32 %v1169_v61, %v1065_v24 }
 0x7b2   : > { %v1176_v63 = vsel %vm315_vm0, %v1172_v62, 0.0 }
 0x7b3   : > { %1177 = vadd.xlane.f32.xlu2 %v1176_v63 }
 0x81e   : > { %v1175_v0 = vpop.xlane.xlu2 %1174 }
 0x81f   : > { %v1179_v1 = vmul.f32 %v1175_v0, %v2953_v10 }
 0x821   : > { %v1181_v2 = vsub.f32 %v1171_v58, %v1179_v1 }
 0x823   : > { %v1183_v3 = vmul.f32 %v1181_v2, %v1181_v2 }
 0x825   : > { %v1185_v38 = vsel %vm315_vm0, %v1183_v3, 0.0 }
 0x826   : > { %1186 = vadd.xlane.f32.xlu2 %v1185_v38  ;;  %v1178_v4 = vpop.xlane.xlu2 %1177 }
 0x827   : > { %v1180_v5 = vmul.f32 %v1178_v4, %v2953_v10 }
 0x829   : > { %v1182_v6 = vsub.f32 %v1172_v62, %v1180_v5 }
 0x82b   : > { %v1184_v7 = vmul.f32 %v1182_v6, %v1182_v6 }
 0x82d   : > { %v1188_v8 = vsel %vm315_vm0, %v1184_v7, 0.0 }
 0x82e   : > { %1189 = vadd.xlane.f32.xlu2 %v1188_v8 }
 0x899   : > { %v1187_v12 = vpop.xlane.xlu2 %1186 }
 0x89a   : > { %v1191_v13 = vmul.f32 %v1187_v12, %v2953_v10 }
 0x89c   : > { %v1193_v14 = vadd.f32 1e-05, %v1191_v13 }
 0x89e   : > { %2766 = vrsqrt.f32 %v1193_v14  ;;  %vm1201_vm4 = vweird.f32 %v1193_v14 }
 0x8a1   : > { %v1190_v17 = vpop.xlane.xlu2 %1189 }
 0x8a2   : > { %v1192_v18 = vmul.f32 %v1190_v17, %v2953_v10 }
 0x8a4   : > { %v2767_v19 = vpop.eup %2766  ;;  %v1194_v20 = vadd.f32 1e-05, %v1192_v18 }
 0x8a5   : > { %v1196_v21 = vmul.f32 %v2767_v19, %v1193_v14  ;;  %vm1202_vm3 = vweird.f32 %v2767_v19 }
 0x8a6   : > { %2768 = vrsqrt.f32 %v1194_v20  ;;  %vm1203_vm5 = vmor %vm1201_vm4, %vm1202_vm3  ;;  %vm1211_vm7 = vweird.f32 %v1194_v20 }
 0x8a7   : > { %v1197_v22 = vmul.f32 %v2767_v19, %v1196_v21 }
 0x8a9   : > { %v1198_v23 = vmul.f32 0.5, %v1197_v22 }
 0x8ab   : > { %v1199_v24 = vsub.f32 1.5, %v1198_v23 }
 0x8ac   : > { %v2769_v25 = vpop.eup %2768 }
 0x8ad   : > { %v1200_v26 = vmul.f32 %v2767_v19, %v1199_v24  ;;  %v1206_v27 = vmul.f32 %v2769_v25, %v1194_v20  ;;  %vm1212_vm6 = vweird.f32 %v2769_v25 }
 0x8ae   : > { %vm1213_vm11 = vmor %vm1211_vm7, %vm1212_vm6  ;;  %vm2077_vm7 = vcmask 1041409  }
 0x8af   : > { %v1207_v28 = vmul.f32 %v2769_v25, %v1206_v27  ;;  %v1204_v30 = vsel %vm1203_vm5, %v2767_v19, %v1200_v26 }
 0x8b0   : > { %v1215_v34 = vmul.f32 %v1204_v30, %v1181_v2 }
 0x8b1   : > { %v1208_v31 = vmul.f32 0.5, %v1207_v28 }
 0x8b2   : > { %v1218_v55 = vmul.f32 %v1217_v33, %v1215_v34 }
 0x8b3   : > { %v1209_v32 = vsub.f32 1.5, %v1208_v31 }
 0x8b4   : > { %v3163_v40 = vadd.f32 %v1220_v37, %v1218_v55 }
 0x8b5   : > { %v1210_v35 = vmul.f32 %v2769_v25, %v1209_v32 }
 0x8b7   : > { %v1214_v36 = vsel %vm1213_vm11, %v2769_v25, %v1210_v35  ;;  %vm2109_vm11 = vcmask 254976  }
 0x8b8   : > { %v1216_v39 = vmul.f32 %v1214_v36, %v1182_v6 }
 0x8ba   : > { %v1219_v57 = vmul.f32 %v1217_v33, %v1216_v39 }
 0x8bc   : > { %v3165_v41 = vadd.f32 %v1220_v37, %v1219_v57 }
 0x8be   : > { %v1227_v42 = vpack.c.bf16 %v3165_v41, %v3163_v40 }
 0x8c0   : > { %2521 = vmatmul.msk.bf16.vlgmr.msra.gmra.mxu1 %vm315_vm0, %v1227_v42 }
 0x93d   : > { %v1253_v44 = vpop.f32.mrf.mxu1 }
 0x93e   : > { %v3171_v45 = vadd.f32 %v1253_v44, %v1228_v43 }
 0x940   : > { %1259 = vrot.lane.b32.xlu0 %v3171_v45, %s2879_s12 }
 0x945   : > { %v1255_v46 = vpop.f32.mrf.mxu1 }
 0x946   : > { %v3175_v47 = vadd.f32 %v1255_v46, %v1228_v43 }
 0x948   : > { %1420 = vrot.lane.b32.xlu1 %v3175_v47, %s2881_s14  ;;  %1286 = vrot.lane.b32.xlu2 %v3175_v47, %s2879_s12  ;;  %v2690_v35 = vpack.i.bf16 %v3171_v45, %v3175_v47 }
 0x949   : > { %1418 = vrot.lane.b32.xlu0 %v3175_v47, %s2880_s13 }
 0x950   : > { %1552 = vrot.lane.b32.xlu2 %v3175_v47, %s2883_s16  ;;  %1390 = vrot.lane.b32.xlu1 %v3171_v45, %s2880_s13 }
 0x951   : > { %1554 = vrot.lane.b32.xlu0 %v3175_v47, %s2885_s18 }
 0x958   : > { %1688 = vrot.lane.b32.xlu2 %v3175_v47, %s2884_s17  ;;  %1526 = vrot.lane.b32.xlu1 %v3171_v45, %s2885_s18 }
 0x959   : > { %1392 = vrot.lane.b32.xlu0 %v3171_v45, %s2881_s14 }
 0x960   : > { %1524 = vrot.lane.b32.xlu2 %v3171_v45, %s2883_s16  ;;  %1658 = vrot.lane.b32.xlu1 %v3171_v45, %s2882_s15 }
 0x961   : > { %1686 = vrot.lane.b32.xlu0 %v3175_v47, %s2882_s15 }
 0x969   : > { %1660 = vrot.lane.b32.xlu0 %v3171_v45, %s2884_s17 }
 0x9a2   : > { %v1287_v48 = vpop.permute.xlu2 %1286 }
 0x9a3   : > { %2524 = vmatpush.xpose.msk.msrb.mxu0 %vm411_vm8, %v1287_v48 }
 0x9a6   : > { %2525 = vmatmul.msk.f32.vlgmr.msrb.gmra.mxu0 %vm411_vm8, %v3175_v47 }
 0x9aa   : > { %v1553_v49 = vpop.permute.xlu2 %1552 }
 0x9b2   : > { %v1260_v50 = vpop.permute.xlu0 %1259  ;;  %v1689_v56 = vpop.permute.xlu2 %1688 }
 0x9b3   : > { %2522 = vmatpush.xpose.msk.msrb.mxu2 %vm411_vm8, %v1260_v50 }
 0x9b6   : > { %2523 = vmatmul.msk.f32.vlgmr.msrb.gmra.mxu2 %vm411_vm8, %v3171_v45 }
 0x9ba   : > { %v1421_v52 = vpop.permute.xlu1 %1420  ;;  %v1525_v61 = vpop.permute.xlu2 %1524 }
 0x9bb   : > { %v1419_v53 = vpop.permute.xlu0 %1418  ;;  %2530 = vmatpush.xpose.msk.msra.mxu3 %vm411_vm8, %v1421_v52 }
 0x9be   : > { %2531 = vmatmul.msk.f32.vlgmr.msra.gmra.mxu3 %vm411_vm8, %v1419_v53 }
 0x9c2   : > { %v1391_v54 = vpop.permute.xlu1 %1390 }
 0x9c3   : > { %v1555_v51 = vpop.permute.xlu0 %1554 }
 0x9c4   : > { %2536 = vmatpush.xpose.msk.msrb.mxu3 %vm411_vm8, %v1555_v51 }
 0x9c7   : > { %2537 = vmatmul.msk.f32.vlgmr.msrb.gmra.mxu3 %vm411_vm8, %v1553_v49 }
 0x9c8   : > { %2542 = vmatpush.xpose.msk.msra.mxu3 %vm411_vm8, %v1689_v56 }
 0x9ca   : > { %v1527_v58 = vpop.permute.xlu1 %1526 }
 0x9cb   : > { %v1393_v59 = vpop.permute.xlu0 %1392 }
 0x9cc   : > { %2528 = vmatpush.xpose.msk.msra.mxu0 %vm411_vm8, %v1393_v59 }
 0x9cf   : > { %2529 = vmatmul.msk.f32.vlgmr.msra.gmra.mxu0 %vm411_vm8, %v1391_v54 }
 0x9d0   : > { %2534 = vmatpush.xpose.msk.msrb.mxu0 %vm411_vm8, %v1527_v58 }
 0x9d2   : > { %v1659_v63 = vpop.permute.xlu1 %1658 }
 0x9d3   : > { %v1687_v60 = vpop.permute.xlu0 %1686 }
 0x9d4   : > { %2543 = vmatmul.msk.f32.vlgmr.msra.gmra.mxu3 %vm411_vm8, %v1687_v60 }
 0x9d7   : > { %2535 = vmatmul.msk.f32.vlgmr.msrb.gmra.mxu0 %vm411_vm8, %v1525_v61 }
 0x9db   : > { %v1661_v62 = vpop.permute.xlu0 %1660 }
 0x9dc   : > { %2540 = vmatpush.xpose.msk.msra.mxu0 %vm411_vm8, %v1661_v62 }
 0x9df   : > { %2541 = vmatmul.msk.f32.vlgmr.msra.gmra.mxu0 %vm411_vm8, %v1659_v63 }
 0xa23   : > { %v1309_v0 = vpop.f32.mrf.mxu0 }
 0xa24   : > { %v1313_v1 = vmul.f32 0.35355338, %v1309_v0 }
 0xa26   : > { %v1315_v2 = vadd.f32 %v1313_v1, %v3048_v16 }
 0xa28   : > { %v1319_v3 = vsel %vm411_vm8, %v1315_v2, -inf }
 0xa29   : > { %1320 = vmax.xlane.f32.xlu2 %v1319_v3 }
 0xa39   : > { %v1282_v38 = vpop.f32.mrf.mxu2 }
 0xa3a   : > { %v1312_v4 = vmul.f32 0.35355338, %v1282_v38 }
 0xa3c   : > { %v1314_v5 = vadd.f32 %v1312_v4, %v3044_v9 }
 0xa3e   : > { %v1316_v6 = vsel %vm411_vm8, %v1314_v5, -inf }
 0xa3f   : > { %1317 = vmax.xlane.f32.xlu0 %v1316_v6 }
 0xa41   : > { %v1443_v7 = vpop.f32.mrf.mxu3 }
 0xa42   : > { %v1447_v8 = vmul.f32 0.35355338, %v1443_v7 }
 0xa44   : > { %v1449_v11 = vadd.f32 %v1447_v8, %v3048_v16 }
 0xa46   : > { %v1453_v12 = vsel %vm411_vm8, %v1449_v11, -inf }
 0xa47   : > { %1454 = vmax.xlane.f32.xlu1 %v1453_v12 }
 0xa4a   : > { %v1577_v13 = vpop.f32.mrf.mxu3 }
 0xa4b   : > { %v1581_v14 = vmul.f32 0.35355338, %v1577_v13 }
 0xa4c   : > { %v1415_v15 = vpop.f32.mrf.mxu0 }
 0xa4d   : > { %v1446_v17 = vmul.f32 0.35355338, %v1415_v15  ;;  %v1583_v18 = vadd.f32 %v1581_v14, %v3048_v16 }
 0xa4f   : > { %v1587_v19 = vsel %vm411_vm8, %v1583_v18, -inf  ;;  %v1448_v20 = vadd.f32 %v1446_v17, %v3044_v9 }
 0xa50   : > { %1588 = vmax.xlane.f32.xlu0 %v1587_v19 }
 0xa51   : > { %v1450_v21 = vsel %vm411_vm8, %v1448_v20, -inf }
 0xa52   : > { %1451 = vmax.xlane.f32.xlu2 %v1450_v21 }
 0xa54   : > { %v1549_v22 = vpop.f32.mrf.mxu0 }
 0xa55   : > { %v1580_v23 = vmul.f32 0.35355338, %v1549_v22 }
 0xa57   : > { %v1711_v24 = vpop.f32.mrf.mxu3  ;;  %v1582_v25 = vadd.f32 %v1580_v23, %v3044_v9 }
 0xa58   : > { %v1715_v26 = vmul.f32 0.35355338, %v1711_v24 }
 0xa59   : > { %v1584_v27 = vsel %vm411_vm8, %v1582_v25, -inf }
 0xa5a   : > { %1585 = vmax.xlane.f32.xlu2 %v1584_v27  ;;  %v1717_v28 = vadd.f32 %v1715_v26, %v3048_v16 }
 0xa5c   : > { %v1683_v30 = vpop.f32.mrf.mxu0  ;;  %v1721_v31 = vsel %vm411_vm8, %v1717_v28, -inf }
 0xa5d   : > { %v1714_v32 = vmul.f32 0.35355338, %v1683_v30  ;;  %1722 = vmax.xlane.f32.xlu1 %v1721_v31 }
 0xa5f   : > { %v1716_v33 = vadd.f32 %v1714_v32, %v3044_v9 }
 0xa61   : > { %v1718_v34 = vsel %vm411_vm8, %v1716_v33, -inf }
 0xa62   : > { %1719 = vmax.xlane.f32.xlu0 %v1718_v34 }
 0xa72   : > { %2691 = vrot.lane.b32.xlu2 %v2690_v35, %s2886_s26 }
 0xa76   : > { %2696 = vrot.lane.b32.xlu1 %v2690_v35, %s2887_s27 }
 0xa7a   : > { %2701 = vrot.lane.b32.xlu2 %v2690_v35, %s2888_s28 }
 0xa9c   : > { %v1321_v16 = vpop.xlane.xlu2 %1320 }
 0xa9d   : > { %v1323_v36 = vsub.f32 %v1315_v2, %v1321_v16 }
 0xa9f   : > { %v1326_v37 = vmul.f32 1.442695, %v1323_v36 }
 0xaa1   : > { %2770 = vpow2.f32 %v1326_v37 }
 0xaa7   : > { %v3242_v55 = vpop.eup %2770 }
 0xaa8   : > { %v1331_v9 = vsel %vm411_vm8, %v3242_v55, 0.0 }
 0xaa9   : > { %1332 = vadd.xlane.f32.xlu2 %v1331_v9 }
 0xab2   : > { %v1318_v39 = vpop.xlane.xlu0 %1317 }
 0xab3   : > { %v1322_v57 = vsub.f32 %v1314_v5, %v1318_v39 }
 0xab5   : > { %v1324_v42 = vmul.f32 1.442695, %v1322_v57 }
 0xab7   : > { %2772 = vpow2.f32 %v1324_v42 }
 0xaba   : > { %v1455_v43 = vpop.xlane.xlu1 %1454 }
 0xabb   : > { %v1457_v44 = vsub.f32 %v1449_v11, %v1455_v43 }
 0xabd   : > { %v3246_v46 = vpop.eup %2772  ;;  %v1460_v48 = vmul.f32 1.442695, %v1457_v44 }
 0xabe   : > { %v1328_v50 = vsel %vm411_vm8, %v3246_v46, 0.0 }
 0xabf   : > { %2774 = vpow2.f32 %v1460_v48  ;;  %1329 = vadd.xlane.f32.xlu1 %v1328_v50 }
 0xac1   : > { %1766 = vrot.lane.b32.xlu2 %v3175_v47, %s2889_s29 }
 0xac3   : > { %v1589_v49 = vpop.xlane.xlu0 %1588 }
 0xac4   : > { %v1591_v52 = vsub.f32 %v1583_v18, %v1589_v49 }
 0xac5   : > { %v3252_v53 = vpop.eup %2774  ;;  %v1452_v54 = vpop.xlane.xlu2 %1451 }
 0xac6   : > { %v1594_v51 = vmul.f32 1.442695, %v1591_v52  ;;  %v1456_v56 = vsub.f32 %v1448_v20, %v1452_v54  ;;  %v1465_v58 = vsel %vm411_vm8, %v3252_v53, 0.0 }
 0xac7   : > { %1466 = vadd.xlane.f32.xlu0 %v1465_v58 }
 0xac8   : > { %2776 = vpow2.f32 %v1594_v51  ;;  %v1458_v59 = vmul.f32 1.442695, %v1456_v56 }
 0xaca   : > { %2778 = vpow2.f32 %v1458_v59 }
 0xacd   : > { %v1586_v60 = vpop.xlane.xlu2 %1585 }
 0xace   : > { %v3256_v61 = vpop.eup %2776  ;;  %v1590_v62 = vsub.f32 %v1582_v25, %v1586_v60 }
 0xacf   : > { %v1599_v47 = vsel %vm411_vm8, %v3256_v61, 0.0 }
 0xad0   : > { %v3260_v63 = vpop.eup %2778  ;;  %v1592_v0 = vmul.f32 1.442695, %v1590_v62  ;;  %v1723_v1 = vpop.xlane.xlu1 %1722  ;;  %1600 = vadd.xlane.f32.xlu0 %v1599_v47 }
 0xad1   : > { %v1725_v2 = vsub.f32 %v1717_v28, %v1723_v1  ;;  %v1462_v3 = vsel %vm411_vm8, %v3260_v63, 0.0  ;;  %v2610_v1 = vld [vmem:[%s2963_s7 + $0x60] sm:$0xff] }
 0xad2   : > { %2780 = vpow2.f32 %v1592_v0  ;;  %1463 = vadd.xlane.f32.xlu1 %v1462_v3  ;;  %v2611_v0 = vld [vmem:[%s2963_s7 + $0x68] sm:$0xff] }
 0xad3   : > { %v1728_v38 = vmul.f32 1.442695, %v1725_v2  ;;  %1849 = vmatpush.bf16.msrb.mxu0 %v2611_v0 }
 0xad5   : > { %v2692_v4 = vpop.permute.xlu2 %2691  ;;  %v1720_v5 = vpop.xlane.xlu0 %1719  ;;  %2782 = vpow2.f32 %v1728_v38 }
 0xad6   : > { %v2694_v6 = vunpack.i.h.bf16 %v2692_v4  ;;  %v2693_v7 = vunpack.i.l.bf16 %v2692_v4  ;;  %v1724_v11 = vsub.f32 %v1716_v33, %v1720_v5 }
 0xad7   : > { %1850 = vmatpush.bf16.msrb.mxu0 %v2610_v1 }
 0xad8   : > { %v2781_v8 = vpop.eup %2780  ;;  %1359 = vmatpush.msrb.mxu1 %v2694_v6  ;;  %1385 = vmatpush.msra.mxu2 %v2693_v7  ;;  %v1726_v13 = vmul.f32 1.442695, %v1724_v11 }
 0xad9   : > { %v1596_v12 = vsel %vm411_vm8, %v2781_v8, 0.0 }
 0xada   : > { %1597 = vadd.xlane.f32.xlu0 %v1596_v12  ;;  %2784 = vpow2.f32 %v1726_v13 }
 0xadb   : > { %v2783_v14 = vpop.eup %2782 }
 0xadc   : > { %v1733_v15 = vsel %vm411_vm8, %v2783_v14, 0.0 }
 0xadd   : > { %v2702_v22 = vpop.permute.xlu2 %2701 }
 0xade   : > { %v2703_v26 = vunpack.i.l.bf16 %v2702_v22  ;;  %v2704_v32 = vunpack.i.h.bf16 %v2702_v22 }
 0xae0   : > { %v2785_v17 = vpop.eup %2784 }
 0xae1   : > { %v1730_v21 = vsel %vm411_vm8, %v2785_v17, 0.0 }
 0xae2   : > { %1734 = vadd.xlane.f32.xlu0 %v1733_v15 }
 0xae8   : > { %v2697_v18 = vpop.permute.xlu1 %2696 }
 0xae9   : > { %v2699_v19 = vunpack.i.h.bf16 %v2697_v18  ;;  %v2698_v20 = vunpack.i.l.bf16 %v2697_v18 }
 0xaea   : > { %1731 = vadd.xlane.f32.xlu0 %v1730_v21 }
 0xaeb   : > { %1493 = vmatpush.msra.mxu1 %v2699_v19  ;;  %1519 = vmatpush.msrb.mxu2 %v2698_v20  ;;  %v1827_v20 = vperm.slane %v3159_v29, 3 }
 0xaec   : > { %1740 = vrot.lane.b32.xlu1 %v3171_v45, %s2889_s29 }
 0xb1c   : > { %v1333_v23 = vpop.xlane.xlu2 %1332 }
 0xb1d   : > { %2786 = vrcp.f32 %v1333_v23 }
 0xb23   : > { %v2787_v24 = vpop.eup %2786 }
 0xb24   : > { %v1337_v25 = vmul.f32 %v2787_v24, %v3242_v55  ;;  %v1767_v35 = vpop.permute.xlu2 %1766 }
 0xb26   : > { %2527 = vmatmul.msk.f32.vlgmr.msra.gmra.mxu2 %vm411_vm8, %v1337_v25 }
 0xb27   : > { %1653 = vmatpush.msra.mxu2 %v2703_v26 }
 0xb32   : > { %v1330_v27 = vpop.xlane.xlu1 %1329 }
 0xb33   : > { %2788 = vrcp.f32 %v1330_v27 }
 0xb39   : > { %v2789_v28 = vpop.eup %2788 }
 0xb3a   : > { %v1336_v30 = vmul.f32 %v2789_v28, %v3246_v46  ;;  %v1467_v31 = vpop.xlane.xlu0 %1466 }
 0xb3b   : > { %2790 = vrcp.f32 %v1467_v31 }
 0xb3c   : > { %2526 = vmatmul.msk.f32.vlgmr.msrb.gmra.mxu1 %vm411_vm8, %v1336_v30 }
 0xb3d   : > { %1627 = vmatpush.msrb.mxu1 %v2704_v32 }
 0xb41   : > { %v2791_v45 = vpop.eup %2790 }
 0xb42   : > { %v1471_v33 = vmul.f32 %v2791_v45, %v3252_v53 }
 0xb43   : > { %v1601_v34 = vpop.xlane.xlu0 %1600 }
 0xb44   : > { %2792 = vrcp.f32 %v1601_v34  ;;  %2533 = vmatmul.msk.f32.vlgmr.msrb.gmra.mxu2 %vm411_vm8, %v1471_v33 }
 0xb45   : > { %v1464_v16 = vpop.xlane.xlu1 %1463  ;;  %1787 = vmatpush.msrb.mxu2 %v1767_v35 }
 0xb46   : > { %2794 = vrcp.f32 %v1464_v16 }
 0xb4a   : > { %v2793_v36 = vpop.eup %2792 }
 0xb4b   : > { %v1605_v37 = vmul.f32 %v2793_v36, %v3256_v61 }
 0xb4c   : > { %v2795_v55 = vpop.eup %2794 }
 0xb4d   : > { %v1470_v9 = vmul.f32 %v2795_v55, %v3260_v63  ;;  %2539 = vmatmul.msk.f32.vlgmr.msra.gmra.mxu2 %vm411_vm8, %v1605_v37  ;;  %v1598_v39 = vpop.xlane.xlu0 %1597 }
 0xb4e   : > { %2796 = vrcp.f32 %v1598_v39  ;;  %v2612_v39 = vld [vmem:[%s2963_s7 + $0x70] sm:$0xff] }
 0xb4f   : > { %2532 = vmatmul.msk.f32.vlgmr.msra.gmra.mxu1 %vm411_vm8, %v1470_v9 }
 0xb54   : > { %v2797_v57 = vpop.eup %2796 }
 0xb55   : > { %v1604_v42 = vmul.f32 %v2797_v57, %v2781_v8  ;;  %v1735_v43 = vpop.xlane.xlu0 %1734 }
 0xb56   : > { %2798 = vrcp.f32 %v1735_v43 }
 0xb57   : > { %2538 = vmatmul.msk.f32.vlgmr.msrb.gmra.mxu1 %vm411_vm8, %v1604_v42 }
 0xb5c   : > { %v2799_v44 = vpop.eup %2798 }
 0xb5d   : > { %v1739_v46 = vmul.f32 %v2799_v44, %v2783_v14  ;;  %v1732_v48 = vpop.xlane.xlu0 %1731 }
 0xb5e   : > { %v1741_v50 = vpop.permute.xlu1 %1740  ;;  %2800 = vrcp.f32 %v1732_v48 }
 0xb5f   : > { %1761 = vmatpush.msra.mxu1 %v1741_v50  ;;  %2545 = vmatmul.msk.f32.vlgmr.msrb.gmra.mxu2 %vm411_vm8, %v1739_v46 }
 0xb64   : > { %v2801_v49 = vpop.eup %2800 }
 0xb65   : > { %v1738_v52 = vmul.f32 %v2801_v49, %v2785_v17 }
 0xb67   : > { %2544 = vmatmul.msk.f32.vlgmr.msra.gmra.mxu1 %vm411_vm8, %v1738_v52 }
 0xba9   : > { %v1387_v53 = vpop.f32.mrf.mxu2 }
 0xbb9   : > { %v1361_v54 = vpop.f32.mrf.mxu1 }
 0xbc7   : > { %v1521_v51 = vpop.f32.mrf.mxu2 }
 0xbcc   : > { %v1495_v56 = vpop.f32.mrf.mxu1 }
 0xbcd   : > { %v2705_v58 = vpack.i.bf16 %v1521_v51, %v1495_v56 }
 0xbcf   : > { %2706 = vrot.lane.b32.xlu0 %v2705_v58, %s2890_s30 }
 0xbd0   : > { %v1655_v59 = vpop.f32.mrf.mxu2 }
 0xbd4   : > { %v1629_v60 = vpop.f32.mrf.mxu1 }
 0xbd5   : > { %v2710_v61 = vpack.i.bf16 %v1655_v59, %v1629_v60  ;;  %v1903_v60 = vperm.slane %v3159_v29, 4 }
 0xbd7   : > { %2711 = vrot.lane.b32.xlu2 %v2710_v61, %s2891_s8 }
 0xbe2   : > { %v1789_v62 = vpop.f32.mrf.mxu2 }
 0xbe4   : > { %v1763_v47 = vpop.f32.mrf.mxu1 }
 0xbe5   : > { %v2715_v63 = vpack.i.bf16 %v1789_v62, %v1763_v47 }
 0xbe7   : > { %2716 = vrot.lane.b32.xlu1 %v2715_v63, %s2892_s9  ;;  %v1906_v63 = vperm.slane %v3159_v29, 5 }
 0xc31   : > { %v2712_v4 = vpop.permute.xlu2 %2711 }
 0xc32   : > { %v2714_v7 = vunpack.i.h.bf16 %v2712_v4  ;;  %v2713_v8 = vunpack.i.l.bf16 %v2712_v4 }
 0xc41   : > { %v2707_v2 = vpop.permute.xlu0 %2706 }
 0xc42   : > { %v2709_v3 = vunpack.i.h.bf16 %v2707_v2  ;;  %v2708_v38 = vunpack.i.l.bf16 %v2707_v2 }
 0xc44   : > { %v1817_v5 = vsel %vm411_vm8, %v1387_v53, %v2709_v3  ;;  %v1816_v6 = vsel %vm411_vm8, %v1361_v54, %v2708_v38 }
 0xc45   : > { %v1818_v14 = vsel %vm973_vm9, %v1816_v6, %v2713_v8  ;;  %v1819_v15 = vsel %vm973_vm9, %v1817_v5, %v2714_v7  ;;  %v2617_v5 = vld [vmem:[%s2963_s7 + $0x98] sm:$0xff]  ;;  %v2616_v6 = vld [vmem:[%s2963_s7 + $0x90] sm:$0xff]  ;;  %v2615_v7 = vld [vmem:[%s2963_s7 + $0x88] sm:$0xff]  ;;  %v1914_v8 = vperm.slane %v3159_v29, 6 }
 0xc46   : > { %2003 = vmatpush.bf16.msrb.mxu1 %v2617_v5  ;;  %v311_v5 = vld [vmem:[%s2973_s11 + $0x10] sm:$0x7]  ;;  %s305_s11 = scalar_lea.vmem %s3373_s5, %s2441_s19 }
 0xc4a   : > { %2004 = vmatpush.bf16.msrb.mxu1 %v2616_v6 }
 0xc4e   : > { %2005 = vmatpush.bf16.msrb.mxu1 %v2615_v7 }
 0xc59   : > { %v2717_v11 = vpop.permute.xlu1 %2716 }
 0xc5a   : > { %v2719_v12 = vunpack.i.h.bf16 %v2717_v11  ;;  %v2718_v13 = vunpack.i.l.bf16 %v2717_v11 }
 0xc5c   : > { %v1820_v17 = vsel %vm976_vm10, %v1818_v14, %v2718_v13  ;;  %v1821_v18 = vsel %vm976_vm10, %v1819_v15, %v2719_v12  ;;  %v2614_v12 = vld [vmem:[%s2963_s7 + $0x80] sm:$0xff] }
 0xc5d   : > { %v1826_v19 = vpack.c.bf16 %v1821_v18, %v1820_v17  ;;  %2006 = vmatpush.bf16.msrb.mxu1 %v2614_v12 }
 0xc5f   : > { %2554 = vmatmul.msk.bf16.vlgmr.msrb.gmra.mxu0 %vm315_vm0, %v1826_v19 }
 0xcdc   : > { %v1852_v21 = vpop.f32.mrf.mxu0 }
 0xcdd   : > { %v1853_v22 = vadd.f32 %v1852_v21, %v1827_v20 }
 0xcdf   : > { %v1857_v23 = vadd.f32 %v1853_v22, %v3163_v40 }
 0xce1   : > { %v1859_v24 = vsel %vm315_vm0, %v1857_v23, 0.0 }
 0xce2   : > { %1860 = vadd.xlane.f32.xlu2 %v1859_v24 }
 0xce4   : > { %v1854_v25 = vpop.f32.mrf.mxu0 }
 0xce5   : > { %v1855_v26 = vadd.f32 %v1854_v25, %v1827_v20 }
 0xce7   : > { %v1858_v27 = vadd.f32 %v1855_v26, %v3165_v41  ;;  %v2613_v41 = vld [vmem:[%s2963_s7 + $0x78] sm:$0xff] }
 0xce8   : > { %1936 = vmatpush.bf16.msrb.mxu3 %v2613_v41 }
 0xce9   : > { %v1862_v28 = vsel %vm315_vm0, %v1858_v27, 0.0 }
 0xcea   : > { %1863 = vadd.xlane.f32.xlu1 %v1862_v28 }
 0xcec   : > { %1937 = vmatpush.bf16.msrb.mxu3 %v2612_v39 }
 0xd55   : > { %v1861_v30 = vpop.xlane.xlu2 %1860 }
 0xd56   : > { %v1865_v31 = vmul.f32 %v1861_v30, %v2953_v10 }
 0xd58   : > { %v1867_v32 = vsub.f32 %v1857_v23, %v1865_v31 }
 0xd5a   : > { %v1869_v45 = vmul.f32 %v1867_v32, %v1867_v32 }
 0xd5c   : > { %v1871_v33 = vsel %vm315_vm0, %v1869_v45, 0.0 }
 0xd5d   : > { %v1864_v40 = vpop.xlane.xlu1 %1863  ;;  %1872 = vadd.xlane.f32.xlu0 %v1871_v33 }
 0xd5e   : > { %v1866_v34 = vmul.f32 %v1864_v40, %v2953_v10 }
 0xd60   : > { %v1868_v35 = vsub.f32 %v1858_v27, %v1866_v34 }
 0xd62   : > { %v1870_v16 = vmul.f32 %v1868_v35, %v1868_v35 }
 0xd64   : > { %v1874_v36 = vsel %vm315_vm0, %v1870_v16, 0.0 }
 0xd65   : > { %1875 = vadd.xlane.f32.xlu2 %v1874_v36 }
 0xdd0   : > { %v1873_v37 = vpop.xlane.xlu0 %1872 }
 0xdd1   : > { %v1877_v55 = vmul.f32 %v1873_v37, %v2953_v10 }
 0xdd3   : > { %v1879_v9 = vadd.f32 1e-05, %v1877_v55 }
 0xdd5   : > { %2802 = vrsqrt.f32 %v1879_v9  ;;  %vm1887_vm9 = vweird.f32 %v1879_v9 }
 0xdd8   : > { %v1876_v57 = vpop.xlane.xlu2 %1875 }
 0xdd9   : > { %v1878_v42 = vmul.f32 %v1876_v57, %v2953_v10 }
 0xddb   : > { %v2803_v43 = vpop.eup %2802  ;;  %v1880_v44 = vadd.f32 1e-05, %v1878_v42 }
 0xddc   : > { %v1882_v46 = vmul.f32 %v2803_v43, %v1879_v9  ;;  %vm1888_vm8 = vweird.f32 %v2803_v43 }
 0xddd   : > { %2804 = vrsqrt.f32 %v1880_v44  ;;  %vm1889_vm10 = vmor %vm1887_vm9, %vm1888_vm8  ;;  %vm1897_vm13 = vweird.f32 %v1880_v44 }
 0xdde   : > { %v1883_v48 = vmul.f32 %v2803_v43, %v1882_v46 }
 0xde0   : > { %v1884_v50 = vmul.f32 0.5, %v1883_v48 }
 0xde2   : > { %v1885_v49 = vsub.f32 1.5, %v1884_v50 }
 0xde3   : > { %v2805_v52 = vpop.eup %2804 }
 0xde4   : > { %v1886_v53 = vmul.f32 %v2803_v43, %v1885_v49  ;;  %v1892_v54 = vmul.f32 %v2805_v52, %v1880_v44  ;;  %vm1898_vm12 = vweird.f32 %v2805_v52 }
 0xde5   : > { %vm1899_vm14 = vmor %vm1897_vm13, %vm1898_vm12 }
 0xde6   : > { %v1893_v51 = vmul.f32 %v2805_v52, %v1892_v54  ;;  %v1890_v56 = vsel %vm1889_vm10, %v2803_v43, %v1886_v53 }
 0xde7   : > { %v1901_v61 = vmul.f32 %v1890_v56, %v1867_v32 }
 0xde8   : > { %v1894_v58 = vmul.f32 0.5, %v1893_v51 }
 0xde9   : > { %v1904_v0 = vmul.f32 %v1903_v60, %v1901_v61  ;;  %v2618_v61 = vld [vmem:[%s2963_s7 + $0xa0] sm:$0xff] }
 0xdea   : > { %v1895_v59 = vsub.f32 1.5, %v1894_v58  ;;  %v2619_v58 = vld [vmem:[%s2963_s7 + $0xa8] sm:$0xff] }
 0xdeb   : > { %v1907_v3 = vadd.f32 %v1906_v63, %v1904_v0  ;;  %2101 = vmatpush.bf16.msra.mxu2 %v2619_v58 }
 0xdec   : > { %v1896_v62 = vmul.f32 %v2805_v52, %v1895_v59 }
 0xdee   : > { %v1900_v47 = vsel %vm1899_vm14, %v2805_v52, %v1896_v62 }
 0xdef   : > { %v1902_v1 = vmul.f32 %v1900_v47, %v1868_v35  ;;  %v1971_v35 = vperm.slane %v3159_v29, 7  ;;  %2102 = vmatpush.bf16.msra.mxu2 %v2618_v61 }
 0xdf1   : > { %v1905_v2 = vmul.f32 %v1903_v60, %v1902_v1 }
 0xdf3   : > { %v1908_v38 = vadd.f32 %v1906_v63, %v1905_v2 }
 0xdf5   : > { %v1913_v4 = vpack.c.bf16 %v1908_v38, %v1907_v3 }
 0xdf7   : > { %2563 = vmatmul.msk.bf16.vlgmr.msrb.gmra.mxu3 %vm315_vm0, %v1913_v4 }
 0xe7a   : > { %v1939_v11 = vpop.f32.mrf.mxu3 }
 0xe7b   : > { %v1940_v13 = vadd.f32 %v1939_v11, %v1914_v8 }
 0xe7d   : > { %v1944_v14 = vmul.f32 %v1940_v13, %v1940_v13 }
 0xe7f   : > { %v1946_v15 = vmul.f32 %v1944_v14, %v1940_v13  ;;  %v2062_v14 = vperm.slane %v311_v5, 1 }
 0xe81   : > { %v1948_v17 = vmul.f32 0.044715, %v1946_v15 }
 0xe82   : > { %v1941_v18 = vpop.f32.mrf.mxu3 }
 0xe83   : > { %v1950_v19 = vadd.f32 %v1948_v17, %v1940_v13  ;;  %v1942_v20 = vadd.f32 %v1941_v18, %v1914_v8  ;;  %v2059_v8 = vperm.slane %v311_v5, 0 }
 0xe85   : > { %v1952_v21 = vmul.f32 0.7978846, %v1950_v19  ;;  %v1945_v22 = vmul.f32 %v1942_v20, %v1942_v20 }
 0xe87   : > { %v1947_v23 = vmul.f32 %v1945_v22, %v1942_v20  ;;  %2806 = vtanh.f32 %v1952_v21 }
 0xe89   : > { %v1949_v24 = vmul.f32 0.044715, %v1947_v23 }
 0xe8b   : > { %v1951_v25 = vadd.f32 %v1949_v24, %v1942_v20 }
 0xe8d   : > { %v1953_v26 = vmul.f32 0.7978846, %v1951_v25  ;;  %v2807_v27 = vpop.eup %2806 }
 0xe8e   : > { %v1956_v28 = vadd.f32 1.0, %v2807_v27 }
 0xe8f   : > { %2808 = vtanh.f32 %v1953_v26 }
 0xe90   : > { %v1958_v31 = vmul.f32 0.5, %v1956_v28 }
 0xe92   : > { %v1960_v33 = vmul.f32 %v1958_v31, %v1940_v13 }
 0xe95   : > { %v2809_v30 = vpop.eup %2808 }
 0xe96   : > { %v1957_v32 = vadd.f32 1.0, %v2809_v30  ;;  %v2071_v30 = vperm.slane %v311_v5, 2 }
 0xe98   : > { %v1959_v45 = vmul.f32 0.5, %v1957_v32 }
 0xe9a   : > { %v1961_v40 = vmul.f32 %v1959_v45, %v1942_v20 }
 0xe9c   : > { %v1970_v34 = vpack.c.bf16 %v1961_v40, %v1960_v33 }
 0xe9e   : > { %2580 = vmatmul.msk.bf16.vlgmr.msrb.gmra.mxu1 %vm1153_vm2, %v1970_v34 }
 0xf1b   : > { %v2008_v16 = vpop.f32.mrf.mxu1 }
 0xf1c   : > { %v2009_v36 = vadd.f32 %v2008_v16, %v1971_v35 }
 0xf1e   : > { %v2013_v41 = vadd.f32 %v2009_v36, %v1907_v3 }
 0xf20   : > { %v2015_v37 = vsel %vm315_vm0, %v2013_v41, 0.0 }
 0xf21   : > { %2016 = vadd.xlane.f32.xlu2 %v2015_v37 }
 0xf23   : > { %v2010_v55 = vpop.f32.mrf.mxu1 }
 0xf24   : > { %v2011_v9 = vadd.f32 %v2010_v55, %v1971_v35 }
 0xf26   : > { %v2014_v39 = vadd.f32 %v2011_v9, %v1908_v38 }
 0xf28   : > { %v2018_v57 = vsel %vm315_vm0, %v2014_v39, 0.0 }
 0xf29   : > { %2019 = vadd.xlane.f32.xlu1 %v2018_v57 }
 0xf94   : > { %v2017_v42 = vpop.xlane.xlu2 %2016 }
 0xf95   : > { %v2021_v43 = vmul.f32 %v2017_v42, %v2953_v10 }
 0xf97   : > { %v2023_v44 = vsub.f32 %v2013_v41, %v2021_v43 }
 0xf99   : > { %v2025_v46 = vmul.f32 %v2023_v44, %v2023_v44 }
 0xf9b   : > { %v2027_v29 = vsel %vm315_vm0, %v2025_v46, 0.0 }
 0xf9c   : > { %v2020_v48 = vpop.xlane.xlu1 %2019  ;;  %2028 = vadd.xlane.f32.xlu0 %v2027_v29 }
 0xf9d   : > { %v2022_v50 = vmul.f32 %v2020_v48, %v2953_v10 }
 0xf9f   : > { %v2024_v49 = vsub.f32 %v2014_v39, %v2022_v50 }
 0xfa1   : > { %v2026_v52 = vmul.f32 %v2024_v49, %v2024_v49 }
 0xfa3   : > { %v2030_v53 = vsel %vm315_vm0, %v2026_v52, 0.0 }
 0xfa4   : > { %2031 = vadd.xlane.f32.xlu1 %v2030_v53 }
0x100f   : > { %v2029_v54 = vpop.xlane.xlu0 %2028 }
0x1010   : > { %v2033_v51 = vmul.f32 %v2029_v54, %v2953_v10 }
0x1012   : > { %v2035_v56 = vadd.f32 1e-05, %v2033_v51 }
0x1014   : > { %2810 = vrsqrt.f32 %v2035_v56  ;;  %vm2043_vm1 = vweird.f32 %v2035_v56 }
0x1017   : > { %v2032_v59 = vpop.xlane.xlu1 %2031 }
0x1018   : > { %v2034_v60 = vmul.f32 %v2032_v59, %v2953_v10 }
0x101a   : > { %v2811_v62 = vpop.eup %2810  ;;  %v2036_v47 = vadd.f32 1e-05, %v2034_v60 }
0x101b   : > { %v2038_v63 = vmul.f32 %v2811_v62, %v2035_v56  ;;  %vm2044_vm15 = vweird.f32 %v2811_v62 }
0x101c   : > { %2812 = vrsqrt.f32 %v2036_v47  ;;  %vm2045_vm3 = vmor %vm2043_vm1, %vm2044_vm15  ;;  %vm2053_vm5 = vweird.f32 %v2036_v47 }
0x101d   : > { %v2039_v0 = vmul.f32 %v2811_v62, %v2038_v63 }
0x101f   : > { %v2040_v1 = vmul.f32 0.5, %v2039_v0 }
0x1021   : > { %v2041_v2 = vsub.f32 1.5, %v2040_v1 }
0x1022   : > { %v2813_v3 = vpop.eup %2812 }
0x1023   : > { %v2042_v38 = vmul.f32 %v2811_v62, %v2041_v2  ;;  %v2048_v4 = vmul.f32 %v2813_v3, %v2036_v47  ;;  %vm2054_vm4 = vweird.f32 %v2813_v3 }
0x1024   : > { %vm2055_vm6 = vmor %vm2053_vm5, %vm2054_vm4 }
0x1025   : > { %v2046_v6 = vsel %vm2045_vm3, %v2811_v62, %v2042_v38  ;;  %v2049_v7 = vmul.f32 %v2813_v3, %v2048_v4 }
0x1026   : > { %v2057_v11 = vmul.f32 %v2046_v6, %v2023_v44 }
0x1027   : > { %v2050_v10 = vmul.f32 0.5, %v2049_v7 }
0x1028   : > { %v2060_v15 = vmul.f32 %v2059_v8, %v2057_v11 }
0x1029   : > { %v2051_v12 = vsub.f32 1.5, %v2050_v10 }
0x102a   : > { %v2063_v19 = vadd.f32 %v2062_v14, %v2060_v15 }
0x102b   : > { %v2052_v13 = vmul.f32 %v2813_v3, %v2051_v12 }
0x102c   : > { %v2069_v22 = vpack.c.bf16 %v2063_v19, %v2063_v19 }
0x102d   : > { %v2056_v17 = vsel %vm2055_vm6, %v2813_v3, %v2052_v13 }
0x102e   : > { %v2058_v18 = vmul.f32 %v2056_v17, %v2024_v49  ;;  %v2074_v25 = vunpack.c.l.b16 %v2069_v22 }
0x1030   : > { %v2061_v20 = vmul.f32 %v2059_v8, %v2058_v18 }
0x1032   : > { %v2064_v21 = vadd.f32 %v2062_v14, %v2061_v20 }
0x1034   : > { %v2070_v23 = vpack.c.bf16 %v2064_v21, %v2064_v21 }
0x1036   : > { %v2075_v24 = vunpack.c.l.b16 %v2070_v23 }
0x1038   : > { %v2076_v26 = vrot.slane %v2075_v24, 7 }
0x103a   : > { %v2078_v27 = vsel %vm2077_vm7, %v2076_v26, %v2074_v25 }
0x103b   : > { %v2079_v28 = vpack.c.b16 %v2078_v27, %v2078_v27 }
0x103d   : > { %2589 = vmatmul.msk.bf16.vlgmr.msra.gmra.mxu2 %vm315_vm0, %v2079_v28 }
0x10c0   : > { %v2104_v31 = vpop.f32.mrf.mxu2 }
0x10c1   : > { %v2105_v32 = vadd.f32 %v2104_v31, %v2071_v30 }
0x10c3   : > { %2814 = vtanh.f32 %v2105_v32 }
0x10c6   : > { %2114 = sbr.rel (%p2590_p4) target bundleno = 4301 (0x10cd), region = 44 }
0x10c8   : > { %v2106_v45 = vpop.f32.mrf.mxu2 }
0x10c9   : > { %v2815_v33 = vpop.eup %2814 }
0x10ca   : > { %2110 = vst.msk [vmem:[%s305_s11] sm:$0x3] %vm2109_vm11, %v2815_v33 }
0x10cb   : > { %2115 = vst.msk [vmem:[#allocation2] sm:$0x3] %vm2109_vm11, %v2815_v33  ;;  %vm2116_vm8 = vcmask 0   ;;  %v2893_v40 = vmov 0.0  }
0x10cc   : > { %2117 = vst.msk [vmem:[#allocation3] sm:$0x1] %vm2116_vm8, %v2893_v40 }
0x10cd PF: > { %p2591_p5 = scmp.ne.s32.totalorder %s2939_s22, 1 }
0x10cf   : > { %2121 = sbr.rel (%p2591_p5) target bundleno = 5047 (0x13b7), region = 48 }
0x10d4   : > { %v2122_v34 = vld [vmem:[#allocation2] sm:$0x3]  ;;  %v2126_v35 = vld [vmem:[%s3372_s4 + $0x18] sm:$0xff]  ;;  %v2125_v16 = vld [vmem:[%s3372_s4 + $0x10] sm:$0xff]  ;;  %v2144_v50 = vmul.f32 %v2815_v33, %v2815_v33  ;;  %v2894_v19 = vmov 0.05  }
0x10d5   : > { %v2127_v36 = vmul.f32 %v2122_v34, %v2122_v34  ;;  %2226 = vmatpush.msra.mxu0 %v2126_v35  ;;  %v2183_v41 = vmul.f32 %v2125_v16, %v2125_v16  ;;  %v2124_v37 = vld [vmem:[%s3372_s4 + $0x8] sm:$0xff]  ;;  %v2123_v55 = vld [vmem:[%s3372_s4] sm:$0xff]  ;;  %v2161_v9 = vmul.f32 %v2815_v33, %v2122_v34  ;;  %v2184_v39 = vmul.f32 %v2126_v35, %v2126_v35 }
0x10d6   : > { %v2182_v57 = vmul.f32 %v2124_v37, %v2124_v37  ;;  %v2181_v42 = vmul.f32 %v2123_v55, %v2123_v55  ;;  %v2145_v54 = vsel %vm2109_vm11, %v2144_v50, 0.0  ;;  %vm2259_vm5 = vcmask 517120  }
0x10d7   : > { %v2128_v43 = vsel %vm2109_vm11, %v2127_v36, 0.0  ;;  %2227 = vmatpush.msra.mxu0 %v2125_v16  ;;  %v2162_v44 = vsel %vm2109_vm11, %v2161_v9, 0.0  ;;  %v2188_v46 = vsel %vm1153_vm2, %v2183_v41, 0.0  ;;  %v2190_v52 = vsel %vm1153_vm2, %v2184_v39, 0.0 }
0x10d8   : > { %2129 = vadd.xlane.f32.xlu0 %v2128_v43  ;;  %v2186_v29 = vsel %vm1153_vm2, %v2182_v57, 0.0  ;;  %v2185_v48 = vsel %vm1153_vm2, %v2181_v42, 0.0  ;;  %2163 = vadd.xlane.f32.xlu1 %v2162_v44 }
0x10d9   : > { %2228 = vmatpush.msra.mxu0 %v2124_v37  ;;  %v2187_v49 = vadd.f32 %v2186_v29, %v2185_v48 }
0x10db   : > { %v2189_v53 = vadd.f32 %v2188_v46, %v2187_v49  ;;  %2229 = vmatpush.msra.mxu0 %v2123_v55 }
0x10dc   : > { %2592 = vmatmul.msk.f32.vlgmr.msra.gmra.mxu0 %vm315_vm0, %v2122_v34 }
0x10dd   : > { %v2191_v51 = vadd.f32 %v2190_v52, %v2189_v53 }
0x10df   : > { %v2192_v56 = vrot.slane %v2191_v51, 4 }
0x10e0   : > { %2146 = vadd.xlane.f32.xlu0 %v2145_v54 }
0x10e1   : > { %v2193_v58 = vadd.f32 %v2192_v56, %v2191_v51 }
0x10e3   : > { %v2194_v59 = vrot.slane %v2193_v58, 2 }
0x10e5   : > { %v2195_v60 = vadd.f32 %v2194_v59, %v2193_v58 }
0x10e7   : > { %v2196_v61 = vrot.slane %v2195_v60, 1 }
0x10e9   : > { %v2197_v62 = vadd.f32 %v2196_v61, %v2195_v60 }
0x10eb   : > { %2816 = vrsqrt.f32 %v2197_v62  ;;  %vm2205_vm0 = vcmp.eq.f32.partialorder %v2197_v62, inf  ;;  %v2208_v11 = vand.u32 2147483648, %v2197_v62  ;;  %vm2207_vm2 = vcmp.eq.f32.partialorder %v2197_v62, 0.0 }
0x10f1   : > { %v2817_v47 = vpop.eup %2816 }
0x10f2   : > { %v2199_v63 = vmul.f32 %v2817_v47, %v2197_v62 }
0x10f4   : > { %v2200_v0 = vmul.f32 %v2817_v47, %v2199_v63 }
0x10f6   : > { %v2201_v1 = vmul.f32 0.5, %v2200_v0 }
0x10f8   : > { %v2202_v3 = vsub.f32 1.5, %v2201_v1 }
0x10fa   : > { %v2203_v38 = vmul.f32 %v2817_v47, %v2202_v3 }
0x10fc   : > { %v2204_v10 = vmul.f32 %v2203_v38, %v2197_v62 }
0x10fe   : > { %v2206_v13 = vsel %vm2205_vm0, %v2197_v62, %v2204_v10 }
0x10ff   : > { %v2209_v18 = vsel %vm2207_vm2, %v2208_v11, %v2206_v13  ;;  %vm2296_vm2 = vcmask 1024  }
0x1100   : > { %v2210_v25 = vmax.f32 %v2209_v18, 1e-08 }
0x114b   : > { %v2130_v2 = vpop.xlane.xlu0 %2129  ;;  %v2164_v63 = vpop.xlane.xlu1 %2163 }
0x114c   : > { %2818 = vrsqrt.f32 %v2130_v2  ;;  %vm2138_vm9 = vcmp.eq.f32.partialorder %v2130_v2, inf  ;;  %v2141_v22 = vand.u32 2147483648, %v2130_v2  ;;  %vm2140_vm10 = vcmp.eq.f32.partialorder %v2130_v2, 0.0 }
0x1152   : > { %v2819_v4 = vpop.eup %2818 }
0x1153   : > { %v2132_v5 = vmul.f32 %v2819_v4, %v2130_v2  ;;  %v2147_v6 = vpop.xlane.xlu0 %2146 }
0x1154   : > { %2820 = vrsqrt.f32 %v2147_v6  ;;  %vm2155_vm12 = vcmp.eq.f32.partialorder %v2147_v6, inf  ;;  %v2158_v45 = vand.u32 2147483648, %v2147_v6  ;;  %vm2157_vm13 = vcmp.eq.f32.partialorder %v2147_v6, 0.0 }
0x1155   : > { %v2133_v7 = vmul.f32 %v2819_v4, %v2132_v5  ;;  %2822 = vrcp.f32 %v2894_v19 }
0x1157   : > { %v2134_v8 = vmul.f32 0.5, %v2133_v7 }
0x1159   : > { %v2135_v12 = vsub.f32 1.5, %v2134_v8  ;;  %v2231_v48 = vpop.f32.mrf.mxu0 }
0x115a   : > { %v2821_v14 = vpop.eup %2820 }
0x115b   : > { %v2136_v15 = vmul.f32 %v2819_v4, %v2135_v12  ;;  %v2149_v17 = vmul.f32 %v2821_v14, %v2147_v6  ;;  %v2823_v30 = vpop.eup %2822 }
0x115c   : > { %v2251_v40 = vmul.f32 0.05, %v2823_v30  ;;  %vm2255_vm1 = vweird.f32 %v2823_v30 }
0x115d   : > { %v2137_v20 = vmul.f32 %v2136_v15, %v2130_v2  ;;  %v2150_v21 = vmul.f32 %v2821_v14, %v2149_v17 }
0x115e   : > { %v2252_v36 = vsub.f32 1.0, %v2251_v40 }
0x115f   : > { %v2139_v23 = vsel %vm2138_vm9, %v2130_v2, %v2137_v20  ;;  %v2151_v24 = vmul.f32 0.5, %v2150_v21 }
0x1160   : > { %v2142_v26 = vsel %vm2140_vm10, %v2141_v22, %v2139_v23  ;;  %v2253_v9 = vmul.f32 %v2823_v30, %v2252_v36  ;;  %v2895_v22 = vmov 65.0   ;;  %vm2317_vm10 = vcmask 0  }
0x1161   : > { %v2143_v27 = vmax.f32 %v2142_v26, 1e-08  ;;  %v2152_v28 = vsub.f32 1.5, %v2151_v24 }
0x1162   : > { %v2254_v44 = vadd.f32 %v2823_v30, %v2253_v9 }
0x1163   : > { %v2153_v31 = vmul.f32 %v2821_v14, %v2152_v28  ;;  %v2234_v32 = vmul.f32 %v2210_v25, %v2143_v27 }
0x1164   : > { %v2256_v54 = vsel %vm2255_vm1, %v2823_v30, %v2254_v44 }
0x1165   : > { %v2154_v33 = vmul.f32 %v2153_v31, %v2147_v6  ;;  %2824 = vrcp.f32 %v2234_v32  ;;  %v2246_v57 = vand.u32 2147483648, %v2234_v32  ;;  %v2244_v43 = vand.u32 2147483647, %v2234_v32 }
0x1166   : > { %vm2240_vm15 = vweird.f32 %v2234_v32 }
0x1167   : > { %v2156_v34 = vsel %vm2155_vm12, %v2147_v6, %v2154_v33  ;;  %v2247_v50 = vor.u32 1.1754944e-38, %v2246_v57  ;;  %vm2245_vm4 = vcmp.eq.f32.partialorder %v2244_v43, 8.507059e+37 }
0x1168   : > { %v2159_v35 = vsel %vm2157_vm13, %v2158_v45, %v2156_v34 }
0x1169   : > { %v2160_v16 = vmax.f32 %v2159_v35, 1e-08 }
0x116b   : > { %v2825_v41 = vpop.eup %2824  ;;  %v2165_v37 = vmul.f32 %v2160_v16, %v2143_v27 }
0x116c   : > { %v2236_v55 = vmul.f32 %v2825_v41, %v2234_v32  ;;  %vm2241_vm14 = vweird.f32 %v2825_v41 }
0x116d   : > { %2826 = vrcp.f32 %v2165_v37  ;;  %vm2242_vm3 = vmor %vm2240_vm15, %vm2241_vm14  ;;  %v2177_v58 = vand.u32 2147483648, %v2165_v37  ;;  %v2175_v61 = vand.u32 2147483647, %v2165_v37  ;;  %vm2171_vm7 = vweird.f32 %v2165_v37 }
0x116e   : > { %v2237_v39 = vsub.f32 1.0, %v2236_v55 }
0x116f   : > { %v2178_v0 = vor.u32 1.1754944e-38, %v2177_v58  ;;  %vm2176_vm8 = vcmp.eq.f32.partialorder %v2175_v61, 8.507059e+37 }
0x1170   : > { %v2238_v42 = vmul.f32 %v2825_v41, %v2237_v39 }
0x1172   : > { %v2239_v46 = vadd.f32 %v2825_v41, %v2238_v42 }
0x1173   : > { %v2827_v29 = vpop.eup %2826 }
0x1174   : > { %v2243_v49 = vsel %vm2242_vm3, %v2825_v41, %v2239_v46  ;;  %v2167_v52 = vmul.f32 %v2827_v29, %v2165_v37  ;;  %vm2172_vm6 = vweird.f32 %v2827_v29  ;;  %v2896_v41 = vmov 2.0  }
0x1175   : > { %v2248_v53 = vsel %vm2245_vm4, %v2247_v50, %v2243_v49  ;;  %vm2173_vm11 = vmor %vm2171_vm7, %vm2172_vm6 }
0x1176   : > { %v2249_v51 = vmul.f32 %v2248_v53, %v2231_v48  ;;  %v2168_v56 = vsub.f32 1.0, %v2167_v52 }
0x1178   : > { %v2258_v59 = vmul.f32 %v2256_v54, %v2249_v51  ;;  %v2169_v60 = vmul.f32 %v2827_v29, %v2168_v56 }
0x117a   : > { %v2260_v62 = vsel %vm2259_vm5, %v2258_v59, -inf  ;;  %v2170_v47 = vadd.f32 %v2827_v29, %v2169_v60 }
0x117b   : > { %2261 = vmax.xlane.f32.xlu1 %v2260_v62 }
0x117c   : > { %v2174_v1 = vsel %vm2173_vm11, %v2827_v29, %v2170_v47 }
0x117d   : > { %v2179_v2 = vsel %vm2176_vm8, %v2178_v0, %v2174_v1 }
0x117e   : > { %v2180_v3 = vmul.f32 %v2179_v2, %v2164_v63 }
0x1180   : > { %v2257_v38 = vmul.f32 %v2256_v54, %v2180_v3 }
0x11ee   : > { %v2262_v4 = vpop.xlane.xlu1 %2261 }
0x11ef   : > { %v2263_v5 = vmax.f32 %v2262_v4, %v2257_v38 }
0x11f1   : > { %v2267_v6 = vsub.f32 %v2258_v59, %v2263_v5  ;;  %v2264_v11 = vsub.f32 %v2257_v38, %v2263_v5 }
0x11f3   : > { %v2268_v7 = vmul.f32 1.442695, %v2267_v6  ;;  %v2265_v12 = vmul.f32 1.442695, %v2264_v11 }
0x11f5   : > { %2828 = vpow2.f32 %v2268_v7 }
0x11f6   : > { %2830 = vpow2.f32 %v2265_v12 }
0x11fb   : > { %v2829_v10 = vpop.eup %2828 }
0x11fc   : > { %v2270_v8 = vsel %vm2259_vm5, %v2829_v10, 0.0  ;;  %v2831_v13 = vpop.eup %2830 }
0x11fd   : > { %2271 = vadd.xlane.f32.xlu2 %v2270_v8 }
0x1270   : > { %v2272_v14 = vpop.xlane.xlu2 %2271 }
0x1271   : > { %v2273_v15 = vadd.f32 %v2831_v13, %v2272_v14 }
0x1273   : > { %2832 = vlog2.f32 %v2273_v15 }
0x1274   : > { %2834 = vrcp.f32 %v2895_v22 }
0x1275   : > { %2836 = vrcp.f32 %v2896_v41 }
0x1279   : > { %v2833_v17 = vpop.eup %2832 }
0x127a   : > { %v2275_v18 = vmul.f32 0.6931472, %v2833_v17  ;;  %v2835_v23 = vpop.eup %2834 }
0x127b   : > { %v2286_v24 = vmul.f32 65.0, %v2835_v23  ;;  %vm2290_vm0 = vweird.f32 %v2835_v23  ;;  %v2837_v37 = vpop.eup %2836 }
0x127c   : > { %v2276_v19 = vadd.f32 %v2275_v18, %v2263_v5  ;;  %v2308_v55 = vmul.f32 2.0, %v2837_v37  ;;  %vm2312_vm9 = vweird.f32 %v2837_v37 }
0x127d   : > { %v2287_v25 = vsub.f32 1.0, %v2286_v24 }
0x127e   : > { %v2279_v20 = vsub.f32 %v2258_v59, %v2276_v19  ;;  %v2277_v28 = vsub.f32 %v2257_v38, %v2276_v19  ;;  %v2309_v9 = vsub.f32 1.0, %v2308_v55 }
0x127f   : > { %v2288_v26 = vmul.f32 %v2835_v23, %v2287_v25 }
0x1280   : > { %v2280_v21 = vsel %vm2259_vm5, %v2279_v20, 0.0  ;;  %v2278_v45 = vsub.f32 0.0, %v2277_v28  ;;  %v2310_v43 = vmul.f32 %v2837_v37, %v2309_v9 }
0x1281   : > { %2281 = vadd.xlane.f32.xlu2 %v2280_v21  ;;  %v2289_v27 = vadd.f32 %v2835_v23, %v2288_v26 }
0x1282   : > { %v2293_v35 = vmul.f32 0.95, %v2278_v45  ;;  %v2311_v29 = vadd.f32 %v2837_v37, %v2310_v43 }
0x1283   : > { %v2291_v32 = vsel %vm2290_vm0, %v2835_v23, %v2289_v27 }
0x1284   : > { %v2313_v49 = vsel %vm2312_vm9, %v2837_v37, %v2311_v29 }
0x12f4   : > { %v2282_v30 = vpop.xlane.xlu2 %2281 }
0x12f5   : > { %v2283_v31 = vadd.f32 %v2282_v30, %v2277_v28 }
0x12f7   : > { %v2284_v33 = vsub.f32 0.0, %v2283_v31 }
0x12f9   : > { %v2292_v40 = vmul.f32 %v2291_v32, %v2284_v33 }
0x12fb   : > { %v2294_v34 = vmul.f32 0.05, %v2292_v40 }
0x12fd   : > { %v2295_v16 = vadd.f32 %v2294_v34, %v2293_v35 }
0x12ff   : > { %v2297_v36 = vsel %vm2296_vm2, %v2295_v16, 0.0 }
0x1300   : > { %2298 = vadd.xlane.f32.xlu0 %v2297_v36 }
0x1373   : > { %v2299_v39 = vpop.xlane.xlu0 %2298 }
0x1374   : > { %v2300_v57 = vrot.slane %v2299_v39, 4 }
0x1376   : > { %v2301_v42 = vadd.f32 %v2300_v57, %v2299_v39 }
0x1378   : > { %v2302_v44 = vrot.slane %v2301_v42, 2 }
0x137a   : > { %v2303_v46 = vadd.f32 %v2302_v44, %v2301_v42 }
0x137c   : > { %v2304_v48 = vrot.slane %v2303_v46, 1 }
0x137e   : > { %v2305_v50 = vadd.f32 %v2304_v48, %v2303_v46 }
0x1380   : > { %2622 = vpush %v2305_v50 }
0x1381   : > { %2624 = vpush %v2313_v49 }
0x13b1   : > { %s2623_s19 = spop %2622 }
0x13b2   : > { %s2625_s20 = spop %2624 }
0x13b3   : > { %s2315_s24 = smul.f32 %s2625_s20, %s2623_s19 }
0x13b5   : > { %v2316_v52 = vstv %s2315_s24 }
0x13b6   : > { %2318 = vst.msk [vmem:[#allocation3] sm:$0x1] %vm2317_vm10, %v2316_v52 }
0x13b7 PF: > { %p2630_p6 = scmp.eq.s32.totalorder %s2939_s22, 1  ;;  %s2897_s25 = smov [#allocation3]  }
0x13b8   : > { %s2332_s26 = sshll.u32 %s2897_s25, 4  ;;  %s2334_s29 = sshll.u32 %s3374_s6, 4  ;;  %s2333_s26 = int_to_ptr.vmem [resolvable:$true] %s2332_s26  ;;  %s2335_s29 = int_to_ptr.hbm [resolvable:$true] %s2334_s29 }
0x13b9   : > { %2627 = dma.vmem_to_hbm [thread:$0]  (%p2630_p6), %s2333_s26, 16, %s2335_s29, [#allocation4]  }
0x13ba   : > { %2871 = dma.done.wait (%p2630_p6), [#allocation4], 16  }
0x13bb   : > { %2873 = vsyncadd (%p2630_p6), [#allocation4], 4294967280 }
0x13bc PF: > { %s18_s21 = sadd.s32 1, %s2876_s21  }
0x13bd   : > { %p15_p7 = scmp.ge.s32.totalorder %s18_s21, 4  }
0x13bf   :  { %17 = sbr.rel (!%p15_p7) target bundleno = 1 (0x1), region = 96 }
0x13c4   :  { %2355 = vsyncpa [#allocation4], 1 }
0x13c5   :  { %2357 = vsyncpa [#allocation4 + $0x1], 1 }

</bundles_post_ra>
